<compile_context>
chip_gen: v7x
topology: tpu7x:2x2x1
jax: 0.10.0
libtpu: 0.0.40
codegen_flags: <defaults>
</compile_context>

<pallas_src>
import functools
import math

import jax
import jax.numpy as jnp
from jax import lax
from jax.experimental import pallas as pl
from jax.experimental.pallas import tpu as pltpu


# ------------------------- generation-aware sizing -------------------------

def _vmem_capacity_bytes():
    try:
        return int(getattr(pltpu.get_tpu_info(), "vmem_capacity_bytes", 64 << 20))
    except Exception:
        return 64 << 20


_VMEM_CAP = _vmem_capacity_bytes()
_VMEM_LIMIT = int(_VMEM_CAP * 0.75)            # ~48 MiB (v7x) / ~96 MiB (v5e/v6e)
_DEFAULT_TM = 1024 if _VMEM_CAP >= (100 << 20) else 512   # v5e/v6e : v7x


def _round_up(x, m):
    return ((x + m - 1) // m) * m


def _gelu(y):
    # exact (erf) GELU, matching torch.nn.GELU(approximate='none')
    return 0.5 * y * (1.0 + lax.erf(y * (1.0 / math.sqrt(2.0))))


def _pad2d(a, rows, cols):
    r, c = a.shape
    if r == rows and c == cols:
        return a
    return jnp.pad(a, ((0, rows - r), (0, cols - c)))


# ------------------------- K-tiled linear (+bias, +GELU, +residual) -------------------------

def _matmul_kernel(x_ref, w_ref, b_ref, *refs, gelu, has_residual):
    if has_residual:
        r_ref, o_ref, acc_ref = refs
    else:
        r_ref = None
        o_ref, acc_ref = refs

    k = pl.program_id(2)

    @pl.when(k == 0)
    def _():
        acc_ref[...] = jnp.zeros_like(acc_ref)

    # x/w arrive already in bf16 (cast once in the wrapper) -> pure MXU feed.
    acc_ref[...] += jnp.dot(x_ref[...], w_ref[...],
                            preferred_element_type=jnp.float32)

    @pl.when(k == pl.num_programs(2) - 1)
    def _():
        y = acc_ref[...] + b_ref[...]
        if gelu:
            y = _gelu(y)
        if has_residual:
            y = y + r_ref[...].astype(jnp.float32)
        o_ref[...] = y.astype(o_ref.dtype)


def linear(x, w, b, *, gelu=False, residual=None, out_dtype=jnp.bfloat16,
           tm=None, tn=256, tk=512):
    """y = x @ w + b (+ residual), optional exact GELU. Tiled/pipelined MXU matmul."""
    M, K = x.shape
    N = w.shape[1]
    tm = _DEFAULT_TM if tm is None else tm
    tm = min(tm, _round_up(M, 8))
    tn = min(tn, _round_up(N, 128))
    tk = min(tk, _round_up(K, 128))
    Mp, Np, Kp = _round_up(M, tm), _round_up(N, tn), _round_up(K, tk)

    x = x.astype(jnp.bfloat16)                  # stream activations in bf16
    w = w.astype(jnp.bfloat16)

    # Deeper multi-buffering on the streamed operands only when there are
    # enough K steps and VMEM headroom (v5e/v6e); hides exposed W-block DMA.
    deep = (Kp // tk) >= 4 and _VMEM_CAP >= (100 << 20) and hasattr(pl, "Buffered")
    if deep:
        x_spec = pl.BlockSpec((tm, tk), lambda i, j, k: (i, k),
                              pipeline_mode=pl.Buffered(3))
        w_spec = pl.BlockSpec((tk, tn), lambda i, j, k: (k, j),
                              pipeline_mode=pl.Buffered(3))
    else:
        x_spec = pl.BlockSpec((tm, tk), lambda i, j, k: (i, k))
        w_spec = pl.BlockSpec((tk, tn), lambda i, j, k: (k, j))

    inputs = [_pad2d(x, Mp, Kp), _pad2d(w, Kp, Np),
              _pad2d(b.reshape(1, N).astype(jnp.float32), 1, Np)]
    in_specs = [x_spec, w_spec, pl.BlockSpec((1, tn), lambda i, j, k: (0, j))]
    if residual is not None:
        inputs.append(_pad2d(residual, Mp, Np))
        in_specs.append(pl.BlockSpec((tm, tn), lambda i, j, k: (i, j)))

    out = pl.pallas_call(
        functools.partial(_matmul_kernel, gelu=gelu,
                          has_residual=residual is not None),
        grid=(Mp // tm, Np // tn, Kp // tk),
        in_specs=in_specs,
        out_specs=pl.BlockSpec((tm, tn), lambda i, j, k: (i, j)),
        out_shape=jax.ShapeDtypeStruct((Mp, Np), out_dtype),
        scratch_shapes=[pltpu.VMEM((tm, tn), jnp.float32)],
        compiler_params=pltpu.CompilerParams(
            dimension_semantics=("parallel", "parallel", "arbitrary"),
            vmem_limit_bytes=_VMEM_LIMIT,
        ),
    )(*inputs)
    return out[:M, :N]


# ------------------------- fused LayerNorm -> linear (-> GELU) -------------------------

def _ln_matmul_kernel(x_ref, g_ref, bln_ref, w_ref, b_ref, o_ref, h_ref, *, eps, gelu):
    j = pl.program_id(1)

    # Normalize + affine + bf16 cast ONCE per i-tile (the x block is resident
    # across j because its block index is (i, 0)); reused for every N-tile.
    @pl.when(j == 0)
    def _():
        x = x_ref[...].astype(jnp.float32)
        mu = jnp.mean(x, axis=-1, keepdims=True)
        var = jnp.mean((x - mu) ** 2, axis=-1, keepdims=True)
        h = (x - mu) * lax.rsqrt(var + eps) * g_ref[...] + bln_ref[...]
        h_ref[...] = h.astype(jnp.bfloat16)

    y = jnp.dot(h_ref[...], w_ref[...],
                preferred_element_type=jnp.float32) + b_ref[...]
    if gelu:
        y = _gelu(y)
    o_ref[...] = y.astype(o_ref.dtype)


def ln_linear(x, g, b_ln, w, b, *, gelu=False, eps=1e-5, out_dtype=jnp.bfloat16,
              tm=None, tn=512):
    """y = LayerNorm(x) @ w + b (optional GELU); LN fused into the matmul (full K)."""
    M, K = x.shape
    N = w.shape[1]
    tm = _DEFAULT_TM if tm is None else tm
    tm = min(tm, _round_up(M, 8))
    tn = min(tn, _round_up(N, 128))
    Mp, Np = _round_up(M, tm), _round_up(N, tn)

    w = w.astype(jnp.bfloat16)

    out = pl.pallas_call(
        functools.partial(_ln_matmul_kernel, eps=eps, gelu=gelu),
        grid=(Mp // tm, Np // tn),
        in_specs=[
            pl.BlockSpec((tm, K), lambda i, j: (i, 0)),
            pl.BlockSpec((1, K), lambda i, j: (0, 0)),
            pl.BlockSpec((1, K), lambda i, j: (0, 0)),
            pl.BlockSpec((K, tn), lambda i, j: (0, j)),
            pl.BlockSpec((1, tn), lambda i, j: (0, j)),
        ],
        out_specs=pl.BlockSpec((tm, tn), lambda i, j: (i, j)),
        out_shape=jax.ShapeDtypeStruct((Mp, Np), out_dtype),
        scratch_shapes=[pltpu.VMEM((tm, K), jnp.bfloat16)],
        compiler_params=pltpu.CompilerParams(
            # "arbitrary" on j: the normalized-activation scratch carries across j.
            dimension_semantics=("parallel", "arbitrary"),
            vmem_limit_bytes=_VMEM_LIMIT,
        ),
    )(_pad2d(x, Mp, K), g.reshape(1, K).astype(jnp.float32),
      b_ln.reshape(1, K).astype(jnp.float32),
      _pad2d(w, K, Np), _pad2d(b.reshape(1, N).astype(jnp.float32), 1, Np))
    return out[:M, :N]


# ------------------------- multi-head attention (batch x head-group grid) -------------------------

def _attention_kernel(qkv_ref, o_ref, *, heads, head_dim):
    # qkv_ref: (1, S, heads*3*head_dim), per-head layout [q_h | k_h | v_h] (bf16).
    # The 1/sqrt(head_dim) scale is already folded into the q weight columns.
    for h in range(heads):                       # static unroll over heads in group
        base = h * 3 * head_dim
        q = qkv_ref[0, :, base:base + head_dim]                       # (S, hd) bf16
        k = qkv_ref[0, :, base + head_dim:base + 2 * head_dim]
        v = qkv_ref[0, :, base + 2 * head_dim:base + 3 * head_dim]
        # contract last dims of q and k (no explicit K transpose)
        s = lax.dot_general(q, k, (((1,), (1,)), ((), ())),
                            preferred_element_type=jnp.float32)       # (S, S) f32
        s = s - jnp.max(s, axis=-1, keepdims=True)
        p = jnp.exp(s)
        p = p * pl.reciprocal(jnp.sum(p, axis=-1, keepdims=True), approx=True)
        o_ref[0, :, h * head_dim:(h + 1) * head_dim] = jnp.dot(
            p.astype(jnp.bfloat16), v,
            preferred_element_type=jnp.float32).astype(o_ref.dtype)


def attention(qkv, num_heads, head_dim):
    """qkv: [B, S, 3C] (per-head [q|k|v] layout, bf16) -> attention output [B, S, C] bf16."""
    B, S, threeC = qkv.shape
    C = num_heads * head_dim
    # heads per group: smallest divisor of num_heads whose output slice is
    # 128-lane aligned (falls back to all heads -> full-dim block).
    g = num_heads
    for cand in range(1, num_heads + 1):
        if num_heads % cand == 0 and (cand * head_dim) % 128 == 0:
            g = cand
            break
    n_groups = num_heads // g

    return pl.pallas_call(
        functools.partial(_attention_kernel, heads=g, head_dim=head_dim),
        grid=(B, n_groups),
        in_specs=[pl.BlockSpec((1, S, 3 * g * head_dim), lambda b, hg: (b, 0, hg))],
        out_specs=pl.BlockSpec((1, S, g * head_dim), lambda b, hg: (b, 0, hg)),
        out_shape=jax.ShapeDtypeStruct((B, S, C), jnp.bfloat16),
        compiler_params=pltpu.CompilerParams(
            dimension_semantics=("parallel", "parallel"),
            vmem_limit_bytes=_VMEM_LIMIT,
        ),
    )(qkv)


# ------------------------- parameter init -------------------------

def _fold_and_permute_qkv(w, b, num_heads, head_dim):
    """One-time load-time transform of torch-layout qkv params:
       (1) fold the 1/sqrt(head_dim) attention scale into the q columns,
       (2) permute columns so each head's [q|k|v] is contiguous (kernel-friendly)."""
    C = num_heads * head_dim
    scale = head_dim ** -0.5
    w = w.at[:, :C].multiply(scale)
    b = b.at[:C].multiply(scale)
    perm = []
    for h in range(num_heads):
        for part in range(3):
            start = part * C + h * head_dim
            perm.extend(range(start, start + head_dim))
    perm = jnp.asarray(perm, dtype=jnp.int32)
    return w[:, perm], b[perm]


def init_params(key, cfg):
    Cin, p, C = cfg["in_channels"], cfg["patch_size"], cfg["embed_dim"]
    depth, nh = cfg["depth"], cfg["num_heads"]
    hd = C // nh
    hidden = int(C * cfg["mlp_ratio"])
    num_classes = cfg["num_classes"]
    num_patches = (cfg["img_size"] // p) ** 2

    def nrm(k, shape, std=0.02):
        return std * jax.random.normal(k, shape, dtype=jnp.float32)

    keys = iter(jax.random.split(key, 8 + depth * 8))
    params = {
        "patch_w": nrm(next(keys), (Cin * p * p, C)).astype(jnp.bfloat16),
        "patch_b": jnp.zeros((C,), jnp.float32),
        "cls_token": jnp.zeros((1, 1, C), jnp.float32),          # init.constant_(0)
        "pos_embed": nrm(next(keys), (1, num_patches + 1, C)),   # normal(std=0.02)
        "norm_g": jnp.ones((C,), jnp.float32),
        "norm_b": jnp.zeros((C,), jnp.float32),
        "head_w": nrm(next(keys), (C, num_classes)).astype(jnp.bfloat16),
        "head_b": jnp.zeros((num_classes,), jnp.float32),
        "blocks": [],
    }
    for _ in range(depth):
        qkv_w = nrm(next(keys), (C, 3 * C))           # torch layout [q | k | v]
        qkv_b = jnp.zeros((3 * C,), jnp.float32)
        qkv_w, qkv_b = _fold_and_permute_qkv(qkv_w, qkv_b, nh, hd)
        params["blocks"].append({
            "ln1_g": jnp.ones((C,), jnp.float32),
            "ln1_b": jnp.zeros((C,), jnp.float32),
            "qkv_w": qkv_w.astype(jnp.bfloat16),
            "qkv_b": qkv_b,
            "proj_w": nrm(next(keys), (C, C)).astype(jnp.bfloat16),
            "proj_b": jnp.zeros((C,), jnp.float32),
            "ln2_g": jnp.ones((C,), jnp.float32),
            "ln2_b": jnp.zeros((C,), jnp.float32),
            "fc1_w": nrm(next(keys), (C, hidden)).astype(jnp.bfloat16),
            "fc1_b": jnp.zeros((hidden,), jnp.float32),
            "fc2_w": nrm(next(keys), (hidden, C)).astype(jnp.bfloat16),
            "fc2_b": jnp.zeros((C,), jnp.float32),
        })
    return params


# ------------------------- forward pass -------------------------

def vit_forward(x, params, cfg):
    B, Cin, H, W = x.shape
    p, C, nh = cfg["patch_size"], cfg["embed_dim"], cfg["num_heads"]
    gh, gw = H // p, W // p
    N = gh * gw
    hd = C // nh
    S = N + 1

    # --- patch embed: conv(kernel=stride=p) as patch-flatten + tiled matmul (bf16 stream) ---
    patches = (
        x.reshape(B, Cin, gh, p, gw, p)
        .transpose(0, 2, 4, 1, 3, 5)            # [B, gh, gw, Cin, p, p]
        .reshape(B * N, Cin * p * p)
        .astype(jnp.bfloat16)
    )
    tok = linear(patches, params["patch_w"], params["patch_b"],
                 out_dtype=jnp.float32).reshape(B, N, C)

    # --- cls token + positional embedding (dropout p=0 -> identity) ---
    cls = jnp.broadcast_to(params["cls_token"], (B, 1, C))
    xseq = jnp.concatenate([cls, tok], axis=1) + params["pos_embed"]   # [B, S, C]
    xflat = xseq.reshape(B * S, C)          # residual stream kept in f32

    # --- transformer blocks (pre-LN), fused LN/bias/GELU/residual epilogues ---
    for blk in params["blocks"]:
        qkv = ln_linear(xflat, blk["ln1_g"], blk["ln1_b"],
                        blk["qkv_w"], blk["qkv_b"],
                        out_dtype=jnp.bfloat16)                        # [B*S, 3C] bf16
        att = attention(qkv.reshape(B, S, 3 * C), nh, hd)              # [B, S, C] bf16
        xflat = linear(att.reshape(B * S, C), blk["proj_w"], blk["proj_b"],
                       residual=xflat, out_dtype=jnp.float32)          # x + proj(att)
        m = ln_linear(xflat, blk["ln2_g"], blk["ln2_b"],
                      blk["fc1_w"], blk["fc1_b"], gelu=True,
                      out_dtype=jnp.bfloat16)                          # [B*S, hidden] bf16
        xflat = linear(m, blk["fc2_w"], blk["fc2_b"],
                       residual=xflat, out_dtype=jnp.float32)          # x + mlp(x)

    # --- cls-token readout first, then fused final-norm -> classification head ---
    cls_out = xflat.reshape(B, S, C)[:, 0]                             # [B, C]
    logits = ln_linear(cls_out, params["norm_g"], params["norm_b"],
                       params["head_w"], params["head_b"],
                       out_dtype=jnp.float32)                          # [B, num_classes]
    return logits


# ------------------------- main -------------------------

if __name__ == "__main__":
    cfg = dict(
        img_size=16,
        patch_size=4,
        in_channels=4,
        num_classes=8,
        embed_dim=32,
        depth=2,
        num_heads=4,
        mlp_ratio=4.0,
    )
    key = jax.random.PRNGKey(0)
    kx, kp = jax.random.split(key)
    x = jax.random.normal(kx, (2, cfg["in_channels"], cfg["img_size"], cfg["img_size"]),
                          dtype=jnp.float32)
    params = init_params(kp, cfg)

    fwd = jax.jit(functools.partial(vit_forward, cfg=cfg))
    logits = fwd(x, params)
    jax.block_until_ready(logits)
    assert logits.shape == (2, cfg["num_classes"])
    assert bool(jnp.all(jnp.isfinite(logits)))
    print("KERNEL_OK")
</pallas_src>

<mosaic_0001>
module attributes {stable_mosaic.version = 11 : i64} {
  func.func @_matmul_kernel(%arg0: i32, %arg1: i32, %arg2: i32, %arg3: memref<32x128xbf16, #tpu.memory_space<vmem>>, %arg4: memref<128x128xbf16, #tpu.memory_space<vmem>>, %arg5: memref<1x128xf32, #tpu.memory_space<vmem>>, %arg6: memref<32x128xf32, #tpu.memory_space<vmem>>, %arg7: memref<32x128xf32, #tpu.memory_space<vmem>>) attributes {dimension_semantics = [#tpu.dimension_semantics<parallel>, #tpu.dimension_semantics<parallel>, #tpu.dimension_semantics<arbitrary>], iteration_bounds = array<i64: 1, 1, 1>, scalar_prefetch = 0 : i64, scratch_operands = 1 : i64, tpu.core_type = #tpu.core_type<tc>, window_params = [{transform_indices = @transform_0, window_bounds = array<i64: 32, 128>}, {transform_indices = @transform_1, window_bounds = array<i64: 128, 128>}, {transform_indices = @transform_2, window_bounds = array<i64: 1, 128>}, {transform_indices = @transform_3, window_bounds = array<i64: 32, 128>}]} {
    %c0_i32 = arith.constant 0 : i32
    %0 = arith.cmpi eq, %arg2, %c0_i32 : i32
    %1 = arith.extui %0 : i1 to i32
    %c0_i32_0 = arith.constant 0 : i32
    %2 = arith.cmpi ne, %1, %c0_i32_0 : i32
    scf.if %2 {
      %cst_10 = arith.constant 0.000000e+00 : f32
      %12 = vector.broadcast %cst_10 : f32 to vector<32x128xf32>
      %c0_11 = arith.constant 0 : index
      %c0_12 = arith.constant 0 : index
      %13 = vector.load %arg7[%c0_11, %c0_12] : memref<32x128xf32, #tpu.memory_space<vmem>>, vector<32x128xf32>
      tpu.vector_store %arg7[%c0_11, %c0_12], %12 {strides = array<i32>} : memref<32x128xf32, #tpu.memory_space<vmem>>, vector<32x128xf32>,
    } else {
    }
    %c0 = arith.constant 0 : index
    %c0_1 = arith.constant 0 : index
    %3 = vector.load %arg7[%c0, %c0_1] : memref<32x128xf32, #tpu.memory_space<vmem>>, vector<32x128xf32>
    %c0_2 = arith.constant 0 : index
    %c0_3 = arith.constant 0 : index
    %4 = vector.load %arg3[%c0_2, %c0_3] : memref<32x128xbf16, #tpu.memory_space<vmem>>, vector<32x128xbf16>
    %c0_4 = arith.constant 0 : index
    %c0_5 = arith.constant 0 : index
    %5 = vector.load %arg4[%c0_4, %c0_5] : memref<128x128xbf16, #tpu.memory_space<vmem>>, vector<128x128xbf16>
    %cst = arith.constant dense<0.000000e+00> : vector<32x128xf32>
    %6 = tpu.matmul %4, %5, %cst {dimension_numbers = #tpu.dot_dimension_numbers<[1], [0], [0], [1], [0, 0, 1, 1], [], []>} : vector<32x128xbf16>, vector<128x128xbf16>, vector<32x128xf32> -> vector<32x128xf32>
    %7 = arith.addf %3, %6 : vector<32x128xf32>
    %c0_6 = arith.constant 0 : index
    %c0_7 = arith.constant 0 : index
    %8 = vector.load %arg7[%c0_6, %c0_7] : memref<32x128xf32, #tpu.memory_space<vmem>>, vector<32x128xf32>
    tpu.vector_store %arg7[%c0_6, %c0_7], %7 {strides = array<i32>} : memref<32x128xf32, #tpu.memory_space<vmem>>, vector<32x128xf32>,
    %c0_i32_8 = arith.constant 0 : i32
    %9 = arith.cmpi eq, %arg2, %c0_i32_8 : i32
    %10 = arith.extui %9 : i1 to i32
    %c0_i32_9 = arith.constant 0 : i32
    %11 = arith.cmpi ne, %10, %c0_i32_9 : i32
    scf.if %11 {
      %c0_10 = arith.constant 0 : index
      %c0_11 = arith.constant 0 : index
      %12 = vector.load %arg7[%c0_10, %c0_11] : memref<32x128xf32, #tpu.memory_space<vmem>>, vector<32x128xf32>
      %c0_12 = arith.constant 0 : index
      %c0_13 = arith.constant 0 : index
      %13 = vector.load %arg5[%c0_12, %c0_13] : memref<1x128xf32, #tpu.memory_space<vmem>>, vector<1x128xf32>
      %14 = vector.broadcast %13 : vector<1x128xf32> to vector<32x128xf32>
      %15 = arith.addf %12, %14 : vector<32x128xf32>
      %c0_14 = arith.constant 0 : index
      %c0_15 = arith.constant 0 : index
      %16 = vector.load %arg6[%c0_14, %c0_15] : memref<32x128xf32, #tpu.memory_space<vmem>>, vector<32x128xf32>
      tpu.vector_store %arg6[%c0_14, %c0_15], %15 {strides = array<i32>} : memref<32x128xf32, #tpu.memory_space<vmem>>, vector<32x128xf32>,
    } else {
    }
    return
  }
  func.func @transform_0(%arg0: i32, %arg1: i32, %arg2: i32) -> (i32, i32) {
    %c0_i32 = arith.constant 0 : i32
    return %arg0, %arg2 : i32, i32
  }
  func.func @transform_1(%arg0: i32, %arg1: i32, %arg2: i32) -> (i32, i32) {
    %c0_i32 = arith.constant 0 : i32
    return %arg2, %arg1 : i32, i32
  }
  func.func @transform_2(%arg0: i32, %arg1: i32, %arg2: i32) -> (i32, i32) {
    %c0_i32 = arith.constant 0 : i32
    %c0_i32_0 = arith.constant 0 : i32
    return %c0_i32, %arg1 : i32, i32
  }
  func.func @transform_3(%arg0: i32, %arg1: i32, %arg2: i32) -> (i32, i32) {
    %c0_i32 = arith.constant 0 : i32
    return %arg0, %arg1 : i32, i32
  }
}

module attributes {stable_mosaic.version = 11 : i64} {
  func.func @_ln_matmul_kernel(%arg0: i32, %arg1: i32, %arg2: memref<40x32xf32, #tpu.memory_space<vmem>>, %arg3: memref<1x32xf32, #tpu.memory_space<vmem>>, %arg4: memref<1x32xf32, #tpu.memory_space<vmem>>, %arg5: memref<32x128xbf16, #tpu.memory_space<vmem>>, %arg6: memref<1x128xf32, #tpu.memory_space<vmem>>, %arg7: memref<40x128xbf16, #tpu.memory_space<vmem>>, %arg8: memref<40x32xbf16, #tpu.memory_space<vmem>>) attributes {dimension_semantics = [#tpu.dimension_semantics<parallel>, #tpu.dimension_semantics<arbitrary>], iteration_bounds = array<i64: 1, 1>, scalar_prefetch = 0 : i64, scratch_operands = 1 : i64, tpu.core_type = #tpu.core_type<tc>, window_params = [{transform_indices = @transform_0, window_bounds = array<i64: 40, 32>}, {pipeline_mode = #tpu.pipeline_mode<synchronous>, transform_indices = @transform_1, window_bounds = array<i64: 1, 32>}, {pipeline_mode = #tpu.pipeline_mode<synchronous>, transform_indices = @transform_2, window_bounds = array<i64: 1, 32>}, {transform_indices = @transform_3, window_bounds = array<i64: 32, 128>}, {transform_indices = @transform_4, window_bounds = array<i64: 1, 128>}, {transform_indices = @transform_5, window_bounds = array<i64: 40, 128>}]} {
    %c0_i32 = arith.constant 0 : i32
    %0 = arith.cmpi eq, %arg1, %c0_i32 : i32
    %1 = arith.extui %0 : i1 to i32
    %c0_i32_0 = arith.constant 0 : i32
    %2 = arith.cmpi ne, %1, %c0_i32_0 : i32
    scf.if %2 {
      %c0_8 = arith.constant 0 : index
      %c0_9 = arith.constant 0 : index
      %11 = vector.load %arg2[%c0_8, %c0_9] : memref<40x32xf32, #tpu.memory_space<vmem>>, vector<40x32xf32>
      %cst_10 = arith.constant dense<0.000000e+00> : vector<40xf32>
      %12 = vector.multi_reduction <add>, %11, %cst_10 [1] : vector<40x32xf32> to vector<40xf32>
      %13 = vector.shape_cast %12 : vector<40xf32> to vector<40x1xf32>
      %cst_11 = arith.constant 3.200000e+01 : f32
      %14 = vector.broadcast %cst_11 : f32 to vector<40x1xf32>
      %15 = arith.divf %13, %14 : vector<40x1xf32>
      %16 = vector.broadcast %15 : vector<40x1xf32> to vector<40x32xf32>
      %17 = arith.subf %11, %16 : vector<40x32xf32>
      %18 = arith.mulf %17, %17 : vector<40x32xf32>
      %cst_12 = arith.constant dense<0.000000e+00> : vector<40xf32>
      %19 = vector.multi_reduction <add>, %18, %cst_12 [1] : vector<40x32xf32> to vector<40xf32>
      %20 = vector.shape_cast %19 : vector<40xf32> to vector<40x1xf32>
      %cst_13 = arith.constant 3.200000e+01 : f32
      %21 = vector.broadcast %cst_13 : f32 to vector<40x1xf32>
      %22 = arith.divf %20, %21 : vector<40x1xf32>
      %23 = vector.broadcast %15 : vector<40x1xf32> to vector<40x32xf32>
      %24 = arith.subf %11, %23 : vector<40x32xf32>
      %cst_14 = arith.constant 9.99999974E-6 : f32
      %25 = vector.broadcast %cst_14 : f32 to vector<40x1xf32>
      %26 = arith.addf %22, %25 : vector<40x1xf32>
      %27 = math.rsqrt %26 : vector<40x1xf32>
      %28 = vector.broadcast %27 : vector<40x1xf32> to vector<40x32xf32>
      %29 = arith.mulf %24, %28 : vector<40x32xf32>
      %c0_15 = arith.constant 0 : index
      %c0_16 = arith.constant 0 : index
      %30 = vector.load %arg3[%c0_15, %c0_16] : memref<1x32xf32, #tpu.memory_space<vmem>>, vector<1x32xf32>
      %31 = vector.broadcast %30 : vector<1x32xf32> to vector<40x32xf32>
      %32 = arith.mulf %29, %31 : vector<40x32xf32>
      %c0_17 = arith.constant 0 : index
      %c0_18 = arith.constant 0 : index
      %33 = vector.load %arg4[%c0_17, %c0_18] : memref<1x32xf32, #tpu.memory_space<vmem>>, vector<1x32xf32>
      %34 = vector.broadcast %33 : vector<1x32xf32> to vector<40x32xf32>
      %35 = arith.addf %32, %34 : vector<40x32xf32>
      %36 = arith.truncf %35 : vector<40x32xf32> to vector<40x32xbf16>
      %c0_19 = arith.constant 0 : index
      %c0_20 = arith.constant 0 : index
      %37 = vector.load %arg8[%c0_19, %c0_20] : memref<40x32xbf16, #tpu.memory_space<vmem>>, vector<40x32xbf16>
      tpu.vector_store %arg8[%c0_19, %c0_20], %36 {strides = array<i32>} : memref<40x32xbf16, #tpu.memory_space<vmem>>, vector<40x32xbf16>,
    } else {
    }
    %c0 = arith.constant 0 : index
    %c0_1 = arith.constant 0 : index
    %3 = vector.load %arg8[%c0, %c0_1] : memref<40x32xbf16, #tpu.memory_space<vmem>>, vector<40x32xbf16>
    %c0_2 = arith.constant 0 : index
    %c0_3 = arith.constant 0 : index
    %4 = vector.load %arg5[%c0_2, %c0_3] : memref<32x128xbf16, #tpu.memory_space<vmem>>, vector<32x128xbf16>
    %cst = arith.constant dense<0.000000e+00> : vector<40x128xf32>
    %5 = tpu.matmul %3, %4, %cst {dimension_numbers = #tpu.dot_dimension_numbers<[1], [0], [0], [1], [0, 0, 1, 1], [], []>} : vector<40x32xbf16>, vector<32x128xbf16>, vector<40x128xf32> -> vector<40x128xf32>
    %c0_4 = arith.constant 0 : index
    %c0_5 = arith.constant 0 : index
    %6 = vector.load %arg6[%c0_4, %c0_5] : memref<1x128xf32, #tpu.memory_space<vmem>>, vector<1x128xf32>
    %7 = vector.broadcast %6 : vector<1x128xf32> to vector<40x128xf32>
    %8 = arith.addf %5, %7 : vector<40x128xf32>
    %9 = arith.truncf %8 : vector<40x128xf32> to vector<40x128xbf16>
    %c0_6 = arith.constant 0 : index
    %c0_7 = arith.constant 0 : index
    %10 = vector.load %arg7[%c0_6, %c0_7] : memref<40x128xbf16, #tpu.memory_space<vmem>>, vector<40x128xbf16>
    tpu.vector_store %arg7[%c0_6, %c0_7], %9 {strides = array<i32>} : memref<40x128xbf16, #tpu.memory_space<vmem>>, vector<40x128xbf16>,
    return
  }
  func.func @transform_0(%arg0: i32, %arg1: i32) -> (i32, i32) {
    %c0_i32 = arith.constant 0 : i32
    %c0_i32_0 = arith.constant 0 : i32
    return %arg0, %c0_i32 : i32, i32
  }
  func.func @transform_1(%arg0: i32, %arg1: i32) -> (i32, i32) {
    %c0_i32 = arith.constant 0 : i32
    %c0_i32_0 = arith.constant 0 : i32
    %c0_i32_1 = arith.constant 0 : i32
    return %c0_i32, %c0_i32_0 : i32, i32
  }
  func.func @transform_2(%arg0: i32, %arg1: i32) -> (i32, i32) {
    %c0_i32 = arith.constant 0 : i32
    %c0_i32_0 = arith.constant 0 : i32
    %c0_i32_1 = arith.constant 0 : i32
    return %c0_i32, %c0_i32_0 : i32, i32
  }
  func.func @transform_3(%arg0: i32, %arg1: i32) -> (i32, i32) {
    %c0_i32 = arith.constant 0 : i32
    %c0_i32_0 = arith.constant 0 : i32
    return %c0_i32, %arg1 : i32, i32
  }
  func.func @transform_4(%arg0: i32, %arg1: i32) -> (i32, i32) {
    %c0_i32 = arith.constant 0 : i32
    %c0_i32_0 = arith.constant 0 : i32
    return %c0_i32, %arg1 : i32, i32
  }
  func.func @transform_5(%arg0: i32, %arg1: i32) -> (i32, i32) {
    %c0_i32 = arith.constant 0 : i32
    return %arg0, %arg1 : i32, i32
  }
}

module attributes {stable_mosaic.version = 11 : i64} {
  func.func @_attention_kernel(%arg0: i32, %arg1: i32, %arg2: memref<1x17x96xbf16, #tpu.memory_space<vmem>>, %arg3: memref<1x17x32xbf16, #tpu.memory_space<vmem>>) attributes {dimension_semantics = [#tpu.dimension_semantics<parallel>, #tpu.dimension_semantics<parallel>], iteration_bounds = array<i64: 2, 1>, scalar_prefetch = 0 : i64, scratch_operands = 0 : i64, tpu.core_type = #tpu.core_type<tc>, window_params = [{transform_indices = @transform_0, window_bounds = array<i64: 1, 17, 96>}, {transform_indices = @transform_1, window_bounds = array<i64: 1, 17, 32>}]} {
    %c0 = arith.constant 0 : index
    %c0_0 = arith.constant 0 : index
    %c0_1 = arith.constant 0 : index
    %0 = vector.load %arg2[%c0, %c0_0, %c0_1] : memref<1x17x96xbf16, #tpu.memory_space<vmem>>, vector<1x17x8xbf16>
    %1 = vector.shape_cast %0 : vector<1x17x8xbf16> to vector<17x8xbf16>
    %c0_2 = arith.constant 0 : index
    %c0_3 = arith.constant 0 : index
    %c8 = arith.constant 8 : index
    %2 = vector.load %arg2[%c0_2, %c0_3, %c8] : memref<1x17x96xbf16, #tpu.memory_space<vmem>>, vector<1x17x8xbf16>
    %3 = vector.shape_cast %2 : vector<1x17x8xbf16> to vector<17x8xbf16>
    %c0_4 = arith.constant 0 : index
    %c0_5 = arith.constant 0 : index
    %c16 = arith.constant 16 : index
    %4 = vector.load %arg2[%c0_4, %c0_5, %c16] : memref<1x17x96xbf16, #tpu.memory_space<vmem>>, vector<1x17x8xbf16>
    %5 = vector.shape_cast %4 : vector<1x17x8xbf16> to vector<17x8xbf16>
    %cst = arith.constant dense<0.000000e+00> : vector<17x17xf32>
    %6 = tpu.matmul %1, %3, %cst {dimension_numbers = #tpu.dot_dimension_numbers<[1], [1], [0], [0], [0, 0, 1, 0], [], []>} : vector<17x8xbf16>, vector<17x8xbf16>, vector<17x17xf32> -> vector<17x17xf32>
    %cst_6 = arith.constant dense<0xFF800000> : vector<17xf32>
    %7 = vector.multi_reduction <maximumf>, %6, %cst_6 [1] : vector<17x17xf32> to vector<17xf32>
    %8 = vector.shape_cast %7 : vector<17xf32> to vector<17x1xf32>
    %9 = vector.broadcast %8 : vector<17x1xf32> to vector<17x17xf32>
    %10 = arith.subf %6, %9 : vector<17x17xf32>
    %11 = math.exp %10 : vector<17x17xf32>
    %cst_7 = arith.constant dense<0.000000e+00> : vector<17xf32>
    %12 = vector.multi_reduction <add>, %11, %cst_7 [1] : vector<17x17xf32> to vector<17xf32>
    %13 = vector.shape_cast %12 : vector<17xf32> to vector<17x1xf32>
    %14 = tpu.reciprocal %13 {approx = true} : vector<17x1xf32> -> vector<17x1xf32>
    %15 = vector.broadcast %14 : vector<17x1xf32> to vector<17x17xf32>
    %16 = arith.mulf %11, %15 : vector<17x17xf32>
    %17 = arith.truncf %16 : vector<17x17xf32> to vector<17x17xbf16>
    %cst_8 = arith.constant dense<0.000000e+00> : vector<17x8xf32>
    %18 = tpu.matmul %17, %5, %cst_8 {dimension_numbers = #tpu.dot_dimension_numbers<[1], [0], [0], [1], [0, 0, 1, 1], [], []>} : vector<17x17xbf16>, vector<17x8xbf16>, vector<17x8xf32> -> vector<17x8xf32>
    %19 = arith.truncf %18 : vector<17x8xf32> to vector<17x8xbf16>
    %c0_9 = arith.constant 0 : index
    %c0_10 = arith.constant 0 : index
    %c0_11 = arith.constant 0 : index
    %20 = vector.load %arg3[%c0_9, %c0_10, %c0_11] : memref<1x17x32xbf16, #tpu.memory_space<vmem>>, vector<1x17x8xbf16>
    %21 = vector.shape_cast %20 : vector<1x17x8xbf16> to vector<17x8xbf16>
    %22 = vector.shape_cast %19 : vector<17x8xbf16> to vector<1x17x8xbf16>
    tpu.vector_store %arg3[%c0_9, %c0_10, %c0_11], %22 {strides = array<i32>} : memref<1x17x32xbf16, #tpu.memory_space<vmem>>, vector<1x17x8xbf16>,
    %c0_12 = arith.constant 0 : index
    %c0_13 = arith.constant 0 : index
    %c24 = arith.constant 24 : index
    %23 = vector.load %arg2[%c0_12, %c0_13, %c24] : memref<1x17x96xbf16, #tpu.memory_space<vmem>>, vector<1x17x8xbf16>
    %24 = vector.shape_cast %23 : vector<1x17x8xbf16> to vector<17x8xbf16>
    %c0_14 = arith.constant 0 : index
    %c0_15 = arith.constant 0 : index
    %c32 = arith.constant 32 : index
    %25 = vector.load %arg2[%c0_14, %c0_15, %c32] : memref<1x17x96xbf16, #tpu.memory_space<vmem>>, vector<1x17x8xbf16>
    %26 = vector.shape_cast %25 : vector<1x17x8xbf16> to vector<17x8xbf16>
    %c0_16 = arith.constant 0 : index
    %c0_17 = arith.constant 0 : index
    %c40 = arith.constant 40 : index
    %27 = vector.load %arg2[%c0_16, %c0_17, %c40] : memref<1x17x96xbf16, #tpu.memory_space<vmem>>, vector<1x17x8xbf16>
    %28 = vector.shape_cast %27 : vector<1x17x8xbf16> to vector<17x8xbf16>
    %cst_18 = arith.constant dense<0.000000e+00> : vector<17x17xf32>
    %29 = tpu.matmul %24, %26, %cst_18 {dimension_numbers = #tpu.dot_dimension_numbers<[1], [1], [0], [0], [0, 0, 1, 0], [], []>} : vector<17x8xbf16>, vector<17x8xbf16>, vector<17x17xf32> -> vector<17x17xf32>
    %cst_19 = arith.constant dense<0xFF800000> : vector<17xf32>
    %30 = vector.multi_reduction <maximumf>, %29, %cst_19 [1] : vector<17x17xf32> to vector<17xf32>
    %31 = vector.shape_cast %30 : vector<17xf32> to vector<17x1xf32>
    %32 = vector.broadcast %31 : vector<17x1xf32> to vector<17x17xf32>
    %33 = arith.subf %29, %32 : vector<17x17xf32>
    %34 = math.exp %33 : vector<17x17xf32>
    %cst_20 = arith.constant dense<0.000000e+00> : vector<17xf32>
    %35 = vector.multi_reduction <add>, %34, %cst_20 [1] : vector<17x17xf32> to vector<17xf32>
    %36 = vector.shape_cast %35 : vector<17xf32> to vector<17x1xf32>
    %37 = tpu.reciprocal %36 {approx = true} : vector<17x1xf32> -> vector<17x1xf32>
    %38 = vector.broadcast %37 : vector<17x1xf32> to vector<17x17xf32>
    %39 = arith.mulf %34, %38 : vector<17x17xf32>
    %40 = arith.truncf %39 : vector<17x17xf32> to vector<17x17xbf16>
    %cst_21 = arith.constant dense<0.000000e+00> : vector<17x8xf32>
    %41 = tpu.matmul %40, %28, %cst_21 {dimension_numbers = #tpu.dot_dimension_numbers<[1], [0], [0], [1], [0, 0, 1, 1], [], []>} : vector<17x17xbf16>, vector<17x8xbf16>, vector<17x8xf32> -> vector<17x8xf32>
    %42 = arith.truncf %41 : vector<17x8xf32> to vector<17x8xbf16>
    %c0_22 = arith.constant 0 : index
    %c0_23 = arith.constant 0 : index
    %c8_24 = arith.constant 8 : index
    %43 = vector.load %arg3[%c0_22, %c0_23, %c8_24] : memref<1x17x32xbf16, #tpu.memory_space<vmem>>, vector<1x17x8xbf16>
    %44 = vector.shape_cast %43 : vector<1x17x8xbf16> to vector<17x8xbf16>
    %45 = vector.shape_cast %42 : vector<17x8xbf16> to vector<1x17x8xbf16>
    tpu.vector_store %arg3[%c0_22, %c0_23, %c8_24], %45 {strides = array<i32>} : memref<1x17x32xbf16, #tpu.memory_space<vmem>>, vector<1x17x8xbf16>,
    %c0_25 = arith.constant 0 : index
    %c0_26 = arith.constant 0 : index
    %c48 = arith.constant 48 : index
    %46 = vector.load %arg2[%c0_25, %c0_26, %c48] : memref<1x17x96xbf16, #tpu.memory_space<vmem>>, vector<1x17x8xbf16>
    %47 = vector.shape_cast %46 : vector<1x17x8xbf16> to vector<17x8xbf16>
    %c0_27 = arith.constant 0 : index
    %c0_28 = arith.constant 0 : index
    %c56 = arith.constant 56 : index
    %48 = vector.load %arg2[%c0_27, %c0_28, %c56] : memref<1x17x96xbf16, #tpu.memory_space<vmem>>, vector<1x17x8xbf16>
    %49 = vector.shape_cast %48 : vector<1x17x8xbf16> to vector<17x8xbf16>
    %c0_29 = arith.constant 0 : index
    %c0_30 = arith.constant 0 : index
    %c64 = arith.constant 64 : index
    %50 = vector.load %arg2[%c0_29, %c0_30, %c64] : memref<1x17x96xbf16, #tpu.memory_space<vmem>>, vector<1x17x8xbf16>
    %51 = vector.shape_cast %50 : vector<1x17x8xbf16> to vector<17x8xbf16>
    %cst_31 = arith.constant dense<0.000000e+00> : vector<17x17xf32>
    %52 = tpu.matmul %47, %49, %cst_31 {dimension_numbers = #tpu.dot_dimension_numbers<[1], [1], [0], [0], [0, 0, 1, 0], [], []>} : vector<17x8xbf16>, vector<17x8xbf16>, vector<17x17xf32> -> vector<17x17xf32>
    %cst_32 = arith.constant dense<0xFF800000> : vector<17xf32>
    %53 = vector.multi_reduction <maximumf>, %52, %cst_32 [1] : vector<17x17xf32> to vector<17xf32>
    %54 = vector.shape_cast %53 : vector<17xf32> to vector<17x1xf32>
    %55 = vector.broadcast %54 : vector<17x1xf32> to vector<17x17xf32>
    %56 = arith.subf %52, %55 : vector<17x17xf32>
    %57 = math.exp %56 : vector<17x17xf32>
    %cst_33 = arith.constant dense<0.000000e+00> : vector<17xf32>
    %58 = vector.multi_reduction <add>, %57, %cst_33 [1] : vector<17x17xf32> to vector<17xf32>
    %59 = vector.shape_cast %58 : vector<17xf32> to vector<17x1xf32>
    %60 = tpu.reciprocal %59 {approx = true} : vector<17x1xf32> -> vector<17x1xf32>
    %61 = vector.broadcast %60 : vector<17x1xf32> to vector<17x17xf32>
    %62 = arith.mulf %57, %61 : vector<17x17xf32>
    %63 = arith.truncf %62 : vector<17x17xf32> to vector<17x17xbf16>
    %cst_34 = arith.constant dense<0.000000e+00> : vector<17x8xf32>
    %64 = tpu.matmul %63, %51, %cst_34 {dimension_numbers = #tpu.dot_dimension_numbers<[1], [0], [0], [1], [0, 0, 1, 1], [], []>} : vector<17x17xbf16>, vector<17x8xbf16>, vector<17x8xf32> -> vector<17x8xf32>
    %65 = arith.truncf %64 : vector<17x8xf32> to vector<17x8xbf16>
    %c0_35 = arith.constant 0 : index
    %c0_36 = arith.constant 0 : index
    %c16_37 = arith.constant 16 : index
    %66 = vector.load %arg3[%c0_35, %c0_36, %c16_37] : memref<1x17x32xbf16, #tpu.memory_space<vmem>>, vector<1x17x8xbf16>
    %67 = vector.shape_cast %66 : vector<1x17x8xbf16> to vector<17x8xbf16>
    %68 = vector.shape_cast %65 : vector<17x8xbf16> to vector<1x17x8xbf16>
    tpu.vector_store %arg3[%c0_35, %c0_36, %c16_37], %68 {strides = array<i32>} : memref<1x17x32xbf16, #tpu.memory_space<vmem>>, vector<1x17x8xbf16>,
    %c0_38 = arith.constant 0 : index
    %c0_39 = arith.constant 0 : index
    %c72 = arith.constant 72 : index
    %69 = vector.load %arg2[%c0_38, %c0_39, %c72] : memref<1x17x96xbf16, #tpu.memory_space<vmem>>, vector<1x17x8xbf16>
    %70 = vector.shape_cast %69 : vector<1x17x8xbf16> to vector<17x8xbf16>
    %c0_40 = arith.constant 0 : index
    %c0_41 = arith.constant 0 : index
    %c80 = arith.constant 80 : index
    %71 = vector.load %arg2[%c0_40, %c0_41, %c80] : memref<1x17x96xbf16, #tpu.memory_space<vmem>>, vector<1x17x8xbf16>
    %72 = vector.shape_cast %71 : vector<1x17x8xbf16> to vector<17x8xbf16>
    %c0_42 = arith.constant 0 : index
    %c0_43 = arith.constant 0 : index
    %c88 = arith.constant 88 : index
    %73 = vector.load %arg2[%c0_42, %c0_43, %c88] : memref<1x17x96xbf16, #tpu.memory_space<vmem>>, vector<1x17x8xbf16>
    %74 = vector.shape_cast %73 : vector<1x17x8xbf16> to vector<17x8xbf16>
    %cst_44 = arith.constant dense<0.000000e+00> : vector<17x17xf32>
    %75 = tpu.matmul %70, %72, %cst_44 {dimension_numbers = #tpu.dot_dimension_numbers<[1], [1], [0], [0], [0, 0, 1, 0], [], []>} : vector<17x8xbf16>, vector<17x8xbf16>, vector<17x17xf32> -> vector<17x17xf32>
    %cst_45 = arith.constant dense<0xFF800000> : vector<17xf32>
    %76 = vector.multi_reduction <maximumf>, %75, %cst_45 [1] : vector<17x17xf32> to vector<17xf32>
    %77 = vector.shape_cast %76 : vector<17xf32> to vector<17x1xf32>
    %78 = vector.broadcast %77 : vector<17x1xf32> to vector<17x17xf32>
    %79 = arith.subf %75, %78 : vector<17x17xf32>
    %80 = math.exp %79 : vector<17x17xf32>
    %cst_46 = arith.constant dense<0.000000e+00> : vector<17xf32>
    %81 = vector.multi_reduction <add>, %80, %cst_46 [1] : vector<17x17xf32> to vector<17xf32>
    %82 = vector.shape_cast %81 : vector<17xf32> to vector<17x1xf32>
    %83 = tpu.reciprocal %82 {approx = true} : vector<17x1xf32> -> vector<17x1xf32>
    %84 = vector.broadcast %83 : vector<17x1xf32> to vector<17x17xf32>
    %85 = arith.mulf %80, %84 : vector<17x17xf32>
    %86 = arith.truncf %85 : vector<17x17xf32> to vector<17x17xbf16>
    %cst_47 = arith.constant dense<0.000000e+00> : vector<17x8xf32>
    %87 = tpu.matmul %86, %74, %cst_47 {dimension_numbers = #tpu.dot_dimension_numbers<[1], [0], [0], [1], [0, 0, 1, 1], [], []>} : vector<17x17xbf16>, vector<17x8xbf16>, vector<17x8xf32> -> vector<17x8xf32>
    %88 = arith.truncf %87 : vector<17x8xf32> to vector<17x8xbf16>
    %c0_48 = arith.constant 0 : index
    %c0_49 = arith.constant 0 : index
    %c24_50 = arith.constant 24 : index
    %89 = vector.load %arg3[%c0_48, %c0_49, %c24_50] : memref<1x17x32xbf16, #tpu.memory_space<vmem>>, vector<1x17x8xbf16>
    %90 = vector.shape_cast %89 : vector<1x17x8xbf16> to vector<17x8xbf16>
    %91 = vector.shape_cast %88 : vector<17x8xbf16> to vector<1x17x8xbf16>
    tpu.vector_store %arg3[%c0_48, %c0_49, %c24_50], %91 {strides = array<i32>} : memref<1x17x32xbf16, #tpu.memory_space<vmem>>, vector<1x17x8xbf16>,
    return
  }
  func.func @transform_0(%arg0: i32, %arg1: i32) -> (i32, i32, i32) {
    %c0_i32 = arith.constant 0 : i32
    %c0_i32_0 = arith.constant 0 : i32
    return %arg0, %c0_i32, %arg1 : i32, i32, i32
  }
  func.func @transform_1(%arg0: i32, %arg1: i32) -> (i32, i32, i32) {
    %c0_i32 = arith.constant 0 : i32
    %c0_i32_0 = arith.constant 0 : i32
    return %arg0, %c0_i32, %arg1 : i32, i32, i32
  }
}

module attributes {stable_mosaic.version = 11 : i64} {
  func.func @_matmul_kernel(%arg0: i32, %arg1: i32, %arg2: i32, %arg3: memref<40x128xbf16, #tpu.memory_space<vmem>>, %arg4: memref<128x128xbf16, #tpu.memory_space<vmem>>, %arg5: memref<1x128xf32, #tpu.memory_space<vmem>>, %arg6: memref<40x128xf32, #tpu.memory_space<vmem>>, %arg7: memref<40x128xf32, #tpu.memory_space<vmem>>, %arg8: memref<40x128xf32, #tpu.memory_space<vmem>>) attributes {dimension_semantics = [#tpu.dimension_semantics<parallel>, #tpu.dimension_semantics<parallel>, #tpu.dimension_semantics<arbitrary>], iteration_bounds = array<i64: 1, 1, 1>, scalar_prefetch = 0 : i64, scratch_operands = 1 : i64, tpu.core_type = #tpu.core_type<tc>, window_params = [{transform_indices = @transform_0, window_bounds = array<i64: 40, 128>}, {transform_indices = @transform_1, window_bounds = array<i64: 128, 128>}, {transform_indices = @transform_2, window_bounds = array<i64: 1, 128>}, {transform_indices = @transform_3, window_bounds = array<i64: 40, 128>}, {transform_indices = @transform_4, window_bounds = array<i64: 40, 128>}]} {
    %c0_i32 = arith.constant 0 : i32
    %0 = arith.cmpi eq, %arg2, %c0_i32 : i32
    %1 = arith.extui %0 : i1 to i32
    %c0_i32_0 = arith.constant 0 : i32
    %2 = arith.cmpi ne, %1, %c0_i32_0 : i32
    scf.if %2 {
      %cst_10 = arith.constant 0.000000e+00 : f32
      %12 = vector.broadcast %cst_10 : f32 to vector<40x128xf32>
      %c0_11 = arith.constant 0 : index
      %c0_12 = arith.constant 0 : index
      %13 = vector.load %arg8[%c0_11, %c0_12] : memref<40x128xf32, #tpu.memory_space<vmem>>, vector<40x128xf32>
      tpu.vector_store %arg8[%c0_11, %c0_12], %12 {strides = array<i32>} : memref<40x128xf32, #tpu.memory_space<vmem>>, vector<40x128xf32>,
    } else {
    }
    %c0 = arith.constant 0 : index
    %c0_1 = arith.constant 0 : index
    %3 = vector.load %arg8[%c0, %c0_1] : memref<40x128xf32, #tpu.memory_space<vmem>>, vector<40x128xf32>
    %c0_2 = arith.constant 0 : index
    %c0_3 = arith.constant 0 : index
    %4 = vector.load %arg3[%c0_2, %c0_3] : memref<40x128xbf16, #tpu.memory_space<vmem>>, vector<40x128xbf16>
    %c0_4 = arith.constant 0 : index
    %c0_5 = arith.constant 0 : index
    %5 = vector.load %arg4[%c0_4, %c0_5] : memref<128x128xbf16, #tpu.memory_space<vmem>>, vector<128x128xbf16>
    %cst = arith.constant dense<0.000000e+00> : vector<40x128xf32>
    %6 = tpu.matmul %4, %5, %cst {dimension_numbers = #tpu.dot_dimension_numbers<[1], [0], [0], [1], [0, 0, 1, 1], [], []>} : vector<40x128xbf16>, vector<128x128xbf16>, vector<40x128xf32> -> vector<40x128xf32>
    %7 = arith.addf %3, %6 : vector<40x128xf32>
    %c0_6 = arith.constant 0 : index
    %c0_7 = arith.constant 0 : index
    %8 = vector.load %arg8[%c0_6, %c0_7] : memref<40x128xf32, #tpu.memory_space<vmem>>, vector<40x128xf32>
    tpu.vector_store %arg8[%c0_6, %c0_7], %7 {strides = array<i32>} : memref<40x128xf32, #tpu.memory_space<vmem>>, vector<40x128xf32>,
    %c0_i32_8 = arith.constant 0 : i32
    %9 = arith.cmpi eq, %arg2, %c0_i32_8 : i32
    %10 = arith.extui %9 : i1 to i32
    %c0_i32_9 = arith.constant 0 : i32
    %11 = arith.cmpi ne, %10, %c0_i32_9 : i32
    scf.if %11 {
      %c0_10 = arith.constant 0 : index
      %c0_11 = arith.constant 0 : index
      %12 = vector.load %arg8[%c0_10, %c0_11] : memref<40x128xf32, #tpu.memory_space<vmem>>, vector<40x128xf32>
      %c0_12 = arith.constant 0 : index
      %c0_13 = arith.constant 0 : index
      %13 = vector.load %arg5[%c0_12, %c0_13] : memref<1x128xf32, #tpu.memory_space<vmem>>, vector<1x128xf32>
      %14 = vector.broadcast %13 : vector<1x128xf32> to vector<40x128xf32>
      %15 = arith.addf %12, %14 : vector<40x128xf32>
      %c0_14 = arith.constant 0 : index
      %c0_15 = arith.constant 0 : index
      %16 = vector.load %arg6[%c0_14, %c0_15] : memref<40x128xf32, #tpu.memory_space<vmem>>, vector<40x128xf32>
      %17 = arith.addf %15, %16 : vector<40x128xf32>
      %c0_16 = arith.constant 0 : index
      %c0_17 = arith.constant 0 : index
      %18 = vector.load %arg7[%c0_16, %c0_17] : memref<40x128xf32, #tpu.memory_space<vmem>>, vector<40x128xf32>
      tpu.vector_store %arg7[%c0_16, %c0_17], %17 {strides = array<i32>} : memref<40x128xf32, #tpu.memory_space<vmem>>, vector<40x128xf32>,
    } else {
    }
    return
  }
  func.func @transform_0(%arg0: i32, %arg1: i32, %arg2: i32) -> (i32, i32) {
    %c0_i32 = arith.constant 0 : i32
    return %arg0, %arg2 : i32, i32
  }
  func.func @transform_1(%arg0: i32, %arg1: i32, %arg2: i32) -> (i32, i32) {
    %c0_i32 = arith.constant 0 : i32
    return %arg2, %arg1 : i32, i32
  }
  func.func @transform_2(%arg0: i32, %arg1: i32, %arg2: i32) -> (i32, i32) {
    %c0_i32 = arith.constant 0 : i32
    %c0_i32_0 = arith.constant 0 : i32
    return %c0_i32, %arg1 : i32, i32
  }
  func.func @transform_3(%arg0: i32, %arg1: i32, %arg2: i32) -> (i32, i32) {
    %c0_i32 = arith.constant 0 : i32
    return %arg0, %arg1 : i32, i32
  }
  func.func @transform_4(%arg0: i32, %arg1: i32, %arg2: i32) -> (i32, i32) {
    %c0_i32 = arith.constant 0 : i32
    return %arg0, %arg1 : i32, i32
  }
}

module attributes {stable_mosaic.version = 11 : i64} {
  func.func @_ln_matmul_kernel(%arg0: i32, %arg1: i32, %arg2: memref<40x32xf32, #tpu.memory_space<vmem>>, %arg3: memref<1x32xf32, #tpu.memory_space<vmem>>, %arg4: memref<1x32xf32, #tpu.memory_space<vmem>>, %arg5: memref<32x128xbf16, #tpu.memory_space<vmem>>, %arg6: memref<1x128xf32, #tpu.memory_space<vmem>>, %arg7: memref<40x128xbf16, #tpu.memory_space<vmem>>, %arg8: memref<40x32xbf16, #tpu.memory_space<vmem>>) attributes {dimension_semantics = [#tpu.dimension_semantics<parallel>, #tpu.dimension_semantics<arbitrary>], iteration_bounds = array<i64: 1, 1>, scalar_prefetch = 0 : i64, scratch_operands = 1 : i64, tpu.core_type = #tpu.core_type<tc>, window_params = [{transform_indices = @transform_0, window_bounds = array<i64: 40, 32>}, {pipeline_mode = #tpu.pipeline_mode<synchronous>, transform_indices = @transform_1, window_bounds = array<i64: 1, 32>}, {pipeline_mode = #tpu.pipeline_mode<synchronous>, transform_indices = @transform_2, window_bounds = array<i64: 1, 32>}, {transform_indices = @transform_3, window_bounds = array<i64: 32, 128>}, {transform_indices = @transform_4, window_bounds = array<i64: 1, 128>}, {transform_indices = @transform_5, window_bounds = array<i64: 40, 128>}]} {
    %c0_i32 = arith.constant 0 : i32
    %0 = arith.cmpi eq, %arg1, %c0_i32 : i32
    %1 = arith.extui %0 : i1 to i32
    %c0_i32_0 = arith.constant 0 : i32
    %2 = arith.cmpi ne, %1, %c0_i32_0 : i32
    scf.if %2 {
      %c0_11 = arith.constant 0 : index
      %c0_12 = arith.constant 0 : index
      %19 = vector.load %arg2[%c0_11, %c0_12] : memref<40x32xf32, #tpu.memory_space<vmem>>, vector<40x32xf32>
      %cst_13 = arith.constant dense<0.000000e+00> : vector<40xf32>
      %20 = vector.multi_reduction <add>, %19, %cst_13 [1] : vector<40x32xf32> to vector<40xf32>
      %21 = vector.shape_cast %20 : vector<40xf32> to vector<40x1xf32>
      %cst_14 = arith.constant 3.200000e+01 : f32
      %22 = vector.broadcast %cst_14 : f32 to vector<40x1xf32>
      %23 = arith.divf %21, %22 : vector<40x1xf32>
      %24 = vector.broadcast %23 : vector<40x1xf32> to vector<40x32xf32>
      %25 = arith.subf %19, %24 : vector<40x32xf32>
      %26 = arith.mulf %25, %25 : vector<40x32xf32>
      %cst_15 = arith.constant dense<0.000000e+00> : vector<40xf32>
      %27 = vector.multi_reduction <add>, %26, %cst_15 [1] : vector<40x32xf32> to vector<40xf32>
      %28 = vector.shape_cast %27 : vector<40xf32> to vector<40x1xf32>
      %cst_16 = arith.constant 3.200000e+01 : f32
      %29 = vector.broadcast %cst_16 : f32 to vector<40x1xf32>
      %30 = arith.divf %28, %29 : vector<40x1xf32>
      %31 = vector.broadcast %23 : vector<40x1xf32> to vector<40x32xf32>
      %32 = arith.subf %19, %31 : vector<40x32xf32>
      %cst_17 = arith.constant 9.99999974E-6 : f32
      %33 = vector.broadcast %cst_17 : f32 to vector<40x1xf32>
      %34 = arith.addf %30, %33 : vector<40x1xf32>
      %35 = math.rsqrt %34 : vector<40x1xf32>
      %36 = vector.broadcast %35 : vector<40x1xf32> to vector<40x32xf32>
      %37 = arith.mulf %32, %36 : vector<40x32xf32>
      %c0_18 = arith.constant 0 : index
      %c0_19 = arith.constant 0 : index
      %38 = vector.load %arg3[%c0_18, %c0_19] : memref<1x32xf32, #tpu.memory_space<vmem>>, vector<1x32xf32>
      %39 = vector.broadcast %38 : vector<1x32xf32> to vector<40x32xf32>
      %40 = arith.mulf %37, %39 : vector<40x32xf32>
      %c0_20 = arith.constant 0 : index
      %c0_21 = arith.constant 0 : index
      %41 = vector.load %arg4[%c0_20, %c0_21] : memref<1x32xf32, #tpu.memory_space<vmem>>, vector<1x32xf32>
      %42 = vector.broadcast %41 : vector<1x32xf32> to vector<40x32xf32>
      %43 = arith.addf %40, %42 : vector<40x32xf32>
      %44 = arith.truncf %43 : vector<40x32xf32> to vector<40x32xbf16>
      %c0_22 = arith.constant 0 : index
      %c0_23 = arith.constant 0 : index
      %45 = vector.load %arg8[%c0_22, %c0_23] : memref<40x32xbf16, #tpu.memory_space<vmem>>, vector<40x32xbf16>
      tpu.vector_store %arg8[%c0_22, %c0_23], %44 {strides = array<i32>} : memref<40x32xbf16, #tpu.memory_space<vmem>>, vector<40x32xbf16>,
    } else {
    }
    %c0 = arith.constant 0 : index
    %c0_1 = arith.constant 0 : index
    %3 = vector.load %arg8[%c0, %c0_1] : memref<40x32xbf16, #tpu.memory_space<vmem>>, vector<40x32xbf16>
    %c0_2 = arith.constant 0 : index
    %c0_3 = arith.constant 0 : index
    %4 = vector.load %arg5[%c0_2, %c0_3] : memref<32x128xbf16, #tpu.memory_space<vmem>>, vector<32x128xbf16>
    %cst = arith.constant dense<0.000000e+00> : vector<40x128xf32>
    %5 = tpu.matmul %3, %4, %cst {dimension_numbers = #tpu.dot_dimension_numbers<[1], [0], [0], [1], [0, 0, 1, 1], [], []>} : vector<40x32xbf16>, vector<32x128xbf16>, vector<40x128xf32> -> vector<40x128xf32>
    %c0_4 = arith.constant 0 : index
    %c0_5 = arith.constant 0 : index
    %6 = vector.load %arg6[%c0_4, %c0_5] : memref<1x128xf32, #tpu.memory_space<vmem>>, vector<1x128xf32>
    %7 = vector.broadcast %6 : vector<1x128xf32> to vector<40x128xf32>
    %8 = arith.addf %5, %7 : vector<40x128xf32>
    %cst_6 = arith.constant 5.000000e-01 : f32
    %9 = vector.broadcast %cst_6 : f32 to vector<40x128xf32>
    %10 = arith.mulf %9, %8 : vector<40x128xf32>
    %cst_7 = arith.constant 0.707106769 : f32
    %11 = vector.broadcast %cst_7 : f32 to vector<40x128xf32>
    %12 = arith.mulf %8, %11 : vector<40x128xf32>
    %13 = math.erf %12 : vector<40x128xf32>
    %cst_8 = arith.constant 1.000000e+00 : f32
    %14 = vector.broadcast %cst_8 : f32 to vector<40x128xf32>
    %15 = arith.addf %14, %13 : vector<40x128xf32>
    %16 = arith.mulf %10, %15 : vector<40x128xf32>
    %17 = arith.truncf %16 : vector<40x128xf32> to vector<40x128xbf16>
    %c0_9 = arith.constant 0 : index
    %c0_10 = arith.constant 0 : index
    %18 = vector.load %arg7[%c0_9, %c0_10] : memref<40x128xbf16, #tpu.memory_space<vmem>>, vector<40x128xbf16>
    tpu.vector_store %arg7[%c0_9, %c0_10], %17 {strides = array<i32>} : memref<40x128xbf16, #tpu.memory_space<vmem>>, vector<40x128xbf16>,
    return
  }
  func.func @transform_0(%arg0: i32, %arg1: i32) -> (i32, i32) {
    %c0_i32 = arith.constant 0 : i32
    %c0_i32_0 = arith.constant 0 : i32
    return %arg0, %c0_i32 : i32, i32
  }
  func.func @transform_1(%arg0: i32, %arg1: i32) -> (i32, i32) {
    %c0_i32 = arith.constant 0 : i32
    %c0_i32_0 = arith.constant 0 : i32
    %c0_i32_1 = arith.constant 0 : i32
    return %c0_i32, %c0_i32_0 : i32, i32
  }
  func.func @transform_2(%arg0: i32, %arg1: i32) -> (i32, i32) {
    %c0_i32 = arith.constant 0 : i32
    %c0_i32_0 = arith.constant 0 : i32
    %c0_i32_1 = arith.constant 0 : i32
    return %c0_i32, %c0_i32_0 : i32, i32
  }
  func.func @transform_3(%arg0: i32, %arg1: i32) -> (i32, i32) {
    %c0_i32 = arith.constant 0 : i32
    %c0_i32_0 = arith.constant 0 : i32
    return %c0_i32, %arg1 : i32, i32
  }
  func.func @transform_4(%arg0: i32, %arg1: i32) -> (i32, i32) {
    %c0_i32 = arith.constant 0 : i32
    %c0_i32_0 = arith.constant 0 : i32
    return %c0_i32, %arg1 : i32, i32
  }
  func.func @transform_5(%arg0: i32, %arg1: i32) -> (i32, i32) {
    %c0_i32 = arith.constant 0 : i32
    return %arg0, %arg1 : i32, i32
  }
}

module attributes {stable_mosaic.version = 11 : i64} {
  func.func @_ln_matmul_kernel(%arg0: i32, %arg1: i32, %arg2: memref<8x32xf32, #tpu.memory_space<vmem>>, %arg3: memref<1x32xf32, #tpu.memory_space<vmem>>, %arg4: memref<1x32xf32, #tpu.memory_space<vmem>>, %arg5: memref<32x128xbf16, #tpu.memory_space<vmem>>, %arg6: memref<1x128xf32, #tpu.memory_space<vmem>>, %arg7: memref<8x128xf32, #tpu.memory_space<vmem>>, %arg8: memref<8x32xbf16, #tpu.memory_space<vmem>>) attributes {dimension_semantics = [#tpu.dimension_semantics<parallel>, #tpu.dimension_semantics<arbitrary>], iteration_bounds = array<i64: 1, 1>, scalar_prefetch = 0 : i64, scratch_operands = 1 : i64, tpu.core_type = #tpu.core_type<tc>, window_params = [{transform_indices = @transform_0, window_bounds = array<i64: 8, 32>}, {pipeline_mode = #tpu.pipeline_mode<synchronous>, transform_indices = @transform_1, window_bounds = array<i64: 1, 32>}, {pipeline_mode = #tpu.pipeline_mode<synchronous>, transform_indices = @transform_2, window_bounds = array<i64: 1, 32>}, {transform_indices = @transform_3, window_bounds = array<i64: 32, 128>}, {transform_indices = @transform_4, window_bounds = array<i64: 1, 128>}, {transform_indices = @transform_5, window_bounds = array<i64: 8, 128>}]} {
    %c0_i32 = arith.constant 0 : i32
    %0 = arith.cmpi eq, %arg1, %c0_i32 : i32
    %1 = arith.extui %0 : i1 to i32
    %c0_i32_0 = arith.constant 0 : i32
    %2 = arith.cmpi ne, %1, %c0_i32_0 : i32
    scf.if %2 {
      %c0_8 = arith.constant 0 : index
      %c0_9 = arith.constant 0 : index
      %10 = vector.load %arg2[%c0_8, %c0_9] : memref<8x32xf32, #tpu.memory_space<vmem>>, vector<8x32xf32>
      %cst_10 = arith.constant dense<0.000000e+00> : vector<8xf32>
      %11 = vector.multi_reduction <add>, %10, %cst_10 [1] : vector<8x32xf32> to vector<8xf32>
      %12 = vector.shape_cast %11 : vector<8xf32> to vector<8x1xf32>
      %cst_11 = arith.constant 3.200000e+01 : f32
      %13 = vector.broadcast %cst_11 : f32 to vector<8x1xf32>
      %14 = arith.divf %12, %13 : vector<8x1xf32>
      %15 = vector.broadcast %14 : vector<8x1xf32> to vector<8x32xf32>
      %16 = arith.subf %10, %15 : vector<8x32xf32>
      %17 = arith.mulf %16, %16 : vector<8x32xf32>
      %cst_12 = arith.constant dense<0.000000e+00> : vector<8xf32>
      %18 = vector.multi_reduction <add>, %17, %cst_12 [1] : vector<8x32xf32> to vector<8xf32>
      %19 = vector.shape_cast %18 : vector<8xf32> to vector<8x1xf32>
      %cst_13 = arith.constant 3.200000e+01 : f32
      %20 = vector.broadcast %cst_13 : f32 to vector<8x1xf32>
      %21 = arith.divf %19, %20 : vector<8x1xf32>
      %22 = vector.broadcast %14 : vector<8x1xf32> to vector<8x32xf32>
      %23 = arith.subf %10, %22 : vector<8x32xf32>
      %cst_14 = arith.constant 9.99999974E-6 : f32
      %24 = vector.broadcast %cst_14 : f32 to vector<8x1xf32>
      %25 = arith.addf %21, %24 : vector<8x1xf32>
      %26 = math.rsqrt %25 : vector<8x1xf32>
      %27 = vector.broadcast %26 : vector<8x1xf32> to vector<8x32xf32>
      %28 = arith.mulf %23, %27 : vector<8x32xf32>
      %c0_15 = arith.constant 0 : index
      %c0_16 = arith.constant 0 : index
      %29 = vector.load %arg3[%c0_15, %c0_16] : memref<1x32xf32, #tpu.memory_space<vmem>>, vector<1x32xf32>
      %30 = vector.broadcast %29 : vector<1x32xf32> to vector<8x32xf32>
      %31 = arith.mulf %28, %30 : vector<8x32xf32>
      %c0_17 = arith.constant 0 : index
      %c0_18 = arith.constant 0 : index
      %32 = vector.load %arg4[%c0_17, %c0_18] : memref<1x32xf32, #tpu.memory_space<vmem>>, vector<1x32xf32>
      %33 = vector.broadcast %32 : vector<1x32xf32> to vector<8x32xf32>
      %34 = arith.addf %31, %33 : vector<8x32xf32>
      %35 = arith.truncf %34 : vector<8x32xf32> to vector<8x32xbf16>
      %c0_19 = arith.constant 0 : index
      %c0_20 = arith.constant 0 : index
      %36 = vector.load %arg8[%c0_19, %c0_20] : memref<8x32xbf16, #tpu.memory_space<vmem>>, vector<8x32xbf16>
      tpu.vector_store %arg8[%c0_19, %c0_20], %35 {strides = array<i32>} : memref<8x32xbf16, #tpu.memory_space<vmem>>, vector<8x32xbf16>,
    } else {
    }
    %c0 = arith.constant 0 : index
    %c0_1 = arith.constant 0 : index
    %3 = vector.load %arg8[%c0, %c0_1] : memref<8x32xbf16, #tpu.memory_space<vmem>>, vector<8x32xbf16>
    %c0_2 = arith.constant 0 : index
    %c0_3 = arith.constant 0 : index
    %4 = vector.load %arg5[%c0_2, %c0_3] : memref<32x128xbf16, #tpu.memory_space<vmem>>, vector<32x128xbf16>
    %cst = arith.constant dense<0.000000e+00> : vector<8x128xf32>
    %5 = tpu.matmul %3, %4, %cst {dimension_numbers = #tpu.dot_dimension_numbers<[1], [0], [0], [1], [0, 0, 1, 1], [], []>} : vector<8x32xbf16>, vector<32x128xbf16>, vector<8x128xf32> -> vector<8x128xf32>
    %c0_4 = arith.constant 0 : index
    %c0_5 = arith.constant 0 : index
    %6 = vector.load %arg6[%c0_4, %c0_5] : memref<1x128xf32, #tpu.memory_space<vmem>>, vector<1x128xf32>
    %7 = vector.broadcast %6 : vector<1x128xf32> to vector<8x128xf32>
    %8 = arith.addf %5, %7 : vector<8x128xf32>
    %c0_6 = arith.constant 0 : index
    %c0_7 = arith.constant 0 : index
    %9 = vector.load %arg7[%c0_6, %c0_7] : memref<8x128xf32, #tpu.memory_space<vmem>>, vector<8x128xf32>
    tpu.vector_store %arg7[%c0_6, %c0_7], %8 {strides = array<i32>} : memref<8x128xf32, #tpu.memory_space<vmem>>, vector<8x128xf32>,
    return
  }
  func.func @transform_0(%arg0: i32, %arg1: i32) -> (i32, i32) {
    %c0_i32 = arith.constant 0 : i32
    %c0_i32_0 = arith.constant 0 : i32
    return %arg0, %c0_i32 : i32, i32
  }
  func.func @transform_1(%arg0: i32, %arg1: i32) -> (i32, i32) {
    %c0_i32 = arith.constant 0 : i32
    %c0_i32_0 = arith.constant 0 : i32
    %c0_i32_1 = arith.constant 0 : i32
    return %c0_i32, %c0_i32_0 : i32, i32
  }
  func.func @transform_2(%arg0: i32, %arg1: i32) -> (i32, i32) {
    %c0_i32 = arith.constant 0 : i32
    %c0_i32_0 = arith.constant 0 : i32
    %c0_i32_1 = arith.constant 0 : i32
    return %c0_i32, %c0_i32_0 : i32, i32
  }
  func.func @transform_3(%arg0: i32, %arg1: i32) -> (i32, i32) {
    %c0_i32 = arith.constant 0 : i32
    %c0_i32_0 = arith.constant 0 : i32
    return %c0_i32, %arg1 : i32, i32
  }
  func.func @transform_4(%arg0: i32, %arg1: i32) -> (i32, i32) {
    %c0_i32 = arith.constant 0 : i32
    %c0_i32_0 = arith.constant 0 : i32
    return %c0_i32, %arg1 : i32, i32
  }
  func.func @transform_5(%arg0: i32, %arg1: i32) -> (i32, i32) {
    %c0_i32 = arith.constant 0 : i32
    return %arg0, %arg1 : i32, i32
  }
}

</mosaic_0001>

<bundles_post_ra>
// kernel: vit_forward.13
= control target key start
LH: loop header
LB: loop body
LE: loop exit
PB: predicated region body
PF: predicated region fallthrough
CT: control target
= control target key end

     0   :  { %vm30_vm0 = vcmask 261120   ;;  %v369_v36 = vmov 0.0   ;;  %vm370_vm1 = vmmov 0   ;;  %vm142_vm2 = vcmask 257024   ;;  %s493_s0 = inlined_call_operand.vmem [shape: f32[40,32], index: 0, kind: input, shape index: {}]   ;;  %s494_s3 = inlined_call_operand.vmem [shape: bf16[32,128], index: 3, kind: input, shape index: {}]   ;;  %s495_s1 = inlined_call_operand.vmem [shape: f32[1,32], index: 1, kind: input, shape index: {}]   ;;  %s496_s2 = inlined_call_operand.vmem [shape: f32[1,32], index: 2, kind: input, shape index: {}]   ;;  %s497_s4 = inlined_call_operand.vmem [shape: f32[1,128], index: 4, kind: input, shape index: {}]   ;;  %s498_s5 = inlined_call_operand.vmem [shape: bf16[40,128], index: 5, kind: output, shape index: {}]  }
   0x1   :  { %v27_v0 = vld [vmem:[%s493_s0 + $0x10] sm:$0xff]  ;;  %v28_v1 = vld [vmem:[%s493_s0 + $0x18] sm:$0xff]  ;;  %v25_v2 = vld [vmem:[%s493_s0] sm:$0xff]  ;;  %348 = vmatprep.subr.bf16.mxu1 %v369_v36  ;;  %332 = vmatprep.subr.bf16.mxu0 %v369_v36 }
   0x2   :  { %v37_v3 = vsel %vm30_vm0, %v27_v0, 0.0  ;;  %v31_v4 = vsel %vm30_vm0, %v25_v2, 0.0  ;;  %v26_v5 = vld [vmem:[%s493_s0 + $0x8] sm:$0xff]  ;;  %v40_v6 = vsel %vm30_vm0, %v28_v1, 0.0  ;;  %v29_v8 = vld [vmem:[%s493_s0 + $0x20] sm:$0xff]  ;;  %340 = vmatprep.mubr.msk.bf16.mxu1 %vm370_vm1, %v369_v36  ;;  %336 = vmatprep.mubr.msk.bf16.mxu0 %vm370_vm1, %v369_v36 }
   0x3   :  { %38 = vadd.xlane.f32.xlu0 %v37_v3  ;;  %32 = vadd.xlane.f32.xlu1 %v31_v4  ;;  %v34_v7 = vsel %vm30_vm0, %v26_v5, 0.0  ;;  %v43_v9 = vsel %vm30_vm0, %v29_v8, 0.0  ;;  %v354_v35 = vld [vmem:[%s494_s3] sm:$0xff]   ;;  %v355_v37 = vld [vmem:[%s494_s3 + $0x8] sm:$0xff]  }
   0x4   :  { %350 = vmatpush3.bf16.msra.mxu1 %v354_v35  ;;  %333 = vmatpush3.bf16.msra.mxu0 %v354_v35  ;;  %v285_v54 = vld [vmem:[%s495_s1] ss:$0 sm:$0xff] }
   0x5   :  { %349 = vmatprep.subr.bf16.mxu1 %v369_v36  ;;  %334 = vmatprep.subr.bf16.mxu0 %v369_v36  ;;  %v286_v56 = vld [vmem:[%s496_s2] ss:$0 sm:$0xff] }
   0x7   :  { %41 = vadd.xlane.f32.xlu0 %v40_v6  ;;  %35 = vadd.xlane.f32.xlu1 %v34_v7 }
   0x8   :  { %351 = vmatpush3.bf16.msra.mxu1 %v355_v37  ;;  %335 = vmatpush3.bf16.msra.mxu0 %v355_v37 }
   0xb   :  { %44 = vadd.xlane.f32.xlu0 %v43_v9 }
  0x90   :  { %v39_v10 = vpop.xlane.xlu0 %38  ;;  %v33_v11 = vpop.xlane.xlu1 %32 }
  0x91   :  { %v49_v12 = vmul.f32 0.03125, %v39_v10  ;;  %v47_v13 = vmul.f32 0.03125, %v33_v11 }
  0x93   :  { %v421_v14 = vsub.f32 %v27_v0, %v49_v12  ;;  %v423_v15 = vsub.f32 %v25_v2, %v47_v13 }
  0x94   :  { %v42_v16 = vpop.xlane.xlu0 %41  ;;  %v36_v17 = vpop.xlane.xlu1 %35 }
  0x95   :  { %v50_v18 = vmul.f32 0.03125, %v42_v16  ;;  %v59_v19 = vmul.f32 %v421_v14, %v421_v14  ;;  %v48_v20 = vmul.f32 0.03125, %v36_v17  ;;  %v57_v21 = vmul.f32 %v423_v15, %v423_v15 }
  0x97   :  { %v429_v22 = vsub.f32 %v28_v1, %v50_v18  ;;  %v68_v23 = vsel %vm30_vm0, %v59_v19, 0.0  ;;  %v432_v24 = vsub.f32 %v26_v5, %v48_v20  ;;  %v62_v28 = vsel %vm30_vm0, %v57_v21, 0.0  ;;  %v292_v19 = vld [vmem:[%s497_s4] ss:$0 sm:$0xff] }
  0x98   :  { %v45_v25 = vpop.xlane.xlu0 %44  ;;  %69 = vadd.xlane.f32.xlu1 %v68_v23 }
  0x99   :  { %v51_v26 = vmul.f32 0.03125, %v45_v25  ;;  %v60_v27 = vmul.f32 %v429_v22, %v429_v22  ;;  %v58_v29 = vmul.f32 %v432_v24, %v432_v24 }
  0x9b   :  { %v439_v30 = vsub.f32 %v29_v8, %v51_v26  ;;  %v71_v31 = vsel %vm30_vm0, %v60_v27, 0.0  ;;  %v65_v33 = vsel %vm30_vm0, %v58_v29, 0.0 }
  0x9c   :  { %72 = vadd.xlane.f32.xlu0 %v71_v31  ;;  %63 = vadd.xlane.f32.xlu1 %v62_v28 }
  0x9d   :  { %v61_v32 = vmul.f32 %v439_v30, %v439_v30 }
  0x9f   :  { %v74_v34 = vsel %vm30_vm0, %v61_v32, 0.0 }
  0xa0   :  { %75 = vadd.xlane.f32.xlu1 %v74_v34  ;;  %66 = vadd.xlane.f32.xlu0 %v65_v33 }
 0x125   :  { %v70_v38 = vpop.xlane.xlu1 %69 }
 0x126   :  { %v79_v39 = vmul.f32 0.03125, %v70_v38 }
 0x128   :  { %v84_v40 = vadd.f32 1e-05, %v79_v39 }
 0x129   :  { %v73_v41 = vpop.xlane.xlu0 %72  ;;  %v64_v42 = vpop.xlane.xlu1 %63 }
 0x12a   :  { %359 = vrsqrt.f32 %v84_v40  ;;  %v80_v43 = vmul.f32 0.03125, %v73_v41  ;;  %v77_v44 = vmul.f32 0.03125, %v64_v42 }
 0x12c   :  { %v85_v45 = vadd.f32 1e-05, %v80_v43  ;;  %v82_v46 = vadd.f32 1e-05, %v77_v44 }
 0x12d   :  { %v67_v47 = vpop.xlane.xlu0 %66  ;;  %v76_v48 = vpop.xlane.xlu1 %75 }
 0x12e   :  { %361 = vrsqrt.f32 %v85_v45  ;;  %v78_v49 = vmul.f32 0.03125, %v67_v47  ;;  %v81_v50 = vmul.f32 0.03125, %v76_v48 }
 0x12f   :  { %363 = vrsqrt.f32 %v82_v46 }
 0x130   :  { %v83_v51 = vadd.f32 1e-05, %v78_v49  ;;  %v86_v52 = vadd.f32 1e-05, %v81_v50 }
 0x132   :  { %365 = vrsqrt.f32 %v83_v51 }
 0x133   :  { %367 = vrsqrt.f32 %v86_v52 }
 0x134   :  { %v360_v53 = vpop.eup %359 }
 0x135   :  { %v94_v55 = vmul.f32 %v360_v53, %v421_v14 }
 0x137   :  { %v106_v57 = vmul.f32 %v285_v54, %v94_v55 }
 0x138   :  { %v362_v58 = vpop.eup %361 }
 0x139   :  { %v364_v59 = vpop.eup %363  ;;  %v118_v60 = vadd.f32 %v286_v56, %v106_v57  ;;  %v95_v61 = vmul.f32 %v362_v58, %v429_v22 }
 0x13a   :  { %v92_v62 = vmul.f32 %v364_v59, %v423_v15 }
 0x13b   :  { %v308_v63 = vpack.c.bf16 %v118_v60, %v118_v60  ;;  %v107_v0 = vmul.f32 %v285_v54, %v95_v61 }
 0x13c   :  { %v366_v1 = vpop.eup %365  ;;  %v104_v2 = vmul.f32 %v285_v54, %v92_v62 }
 0x13d   :  { %v368_v3 = vpop.eup %367  ;;  %145 = vst.msk [vmem:[#allocation2 + $0x8] sm:$0xf] %vm142_vm2, %v308_v63  ;;  %v119_v4 = vadd.f32 %v286_v56, %v107_v0  ;;  %v93_v5 = vmul.f32 %v366_v1, %v432_v24 }
 0x13e   :  { %v116_v6 = vadd.f32 %v286_v56, %v104_v2  ;;  %v96_v7 = vmul.f32 %v368_v3, %v439_v30 }
 0x13f   :  { %v309_v8 = vpack.c.bf16 %v119_v4, %v119_v4  ;;  %v105_v9 = vmul.f32 %v285_v54, %v93_v5 }
 0x140   :  { %v306_v10 = vpack.c.bf16 %v116_v6, %v116_v6  ;;  %v108_v11 = vmul.f32 %v285_v54, %v96_v7 }
 0x141   :  { %146 = vst.msk [vmem:[#allocation2 + $0xc] sm:$0xf] %vm142_vm2, %v309_v8  ;;  %v117_v12 = vadd.f32 %v286_v56, %v105_v9 }
 0x142   :  { %143 = vst.msk [vmem:[#allocation2] sm:$0xf] %vm142_vm2, %v306_v10  ;;  %v120_v13 = vadd.f32 %v286_v56, %v108_v11 }
 0x143   :  { %v307_v14 = vpack.c.bf16 %v117_v12, %v117_v12 }
 0x144   :  { %v310_v15 = vpack.c.bf16 %v120_v13, %v120_v13 }
 0x145   :  { %144 = vst.msk [vmem:[#allocation2 + $0x4] sm:$0xf] %vm142_vm2, %v307_v14 }
 0x146   :  { %147 = vst.msk [vmem:[#allocation2 + $0x10] sm:$0xf] %vm142_vm2, %v310_v15 }
 0x148   :  { %v356_v16 = vld [vmem:[#allocation2 + $0x8] sm:$0xff]  }
 0x149   :  { %341 = vmatmul.mubr.msk.bf16.vlgmr.msra.gmra.mrb[0].mxu1 %vm30_vm0, %v356_v16 }
 0x14a   :  { %344 = vmatprep.mubr.msk.bf16.mxu1 %vm370_vm1, %v369_v36 }
 0x14c   :  { %v357_v17 = vld [vmem:[#allocation2] sm:$0xff]  }
 0x14d   :  { %337 = vmatmul.mubr.msk.bf16.vlgmr.msra.gmra.mrb[0].mxu0 %vm30_vm0, %v357_v17  ;;  %v358_v18 = vld [vmem:[#allocation2 + $0x10] ss:$0 sps:$4 sm:$0xff]  }
 0x151   :  { %345 = vmatmul.mubr.msk.bf16.gmra.mrb[4].mxu1 %vm30_vm0, %v358_v18 }
 0x21c   :  { %v241_v20 = vpop.f32.mrb[0].mxu1 }
 0x21d   :  { %v342_v21 = vpop.f32.mrb[1].mxu1  ;;  %v242_v23 = vadd.f32 %v292_v19, %v241_v20 }
 0x21e   :  { %v244_v22 = vpop.f32.mrb[2].mxu1 }
 0x21f   :  { %v245_v24 = vadd.f32 %v292_v19, %v244_v22  ;;  %v343_v25 = vpop.f32.mrb[3].mxu1 }
 0x220   :  { %v233_v26 = vpop.f32.mrb[0].mxu0 }
 0x221   :  { %v324_v27 = vpack.c.bf16 %v245_v24, %v242_v23  ;;  %v338_v28 = vpop.f32.mrb[1].mxu0  ;;  %v234_v30 = vadd.f32 %v292_v19, %v233_v26 }
 0x222   :  { %v236_v29 = vpop.f32.mrb[2].mxu0 }
 0x223   :  { %326 = vst [vmem:[%s498_s5 + $0x8] sm:$0xff] %v324_v27   ;;  %v237_v31 = vadd.f32 %v292_v19, %v236_v29  ;;  %v339_v32 = vpop.f32.mrb[3].mxu0 }
 0x224   :  { %v249_v33 = vpop.f32.mrb[4].mxu1 }
 0x225   :  { %v319_v34 = vpack.c.bf16 %v237_v31, %v234_v30  ;;  %v250_v35 = vadd.f32 %v292_v19, %v249_v33  ;;  %v346_v36 = vpop.f32.mrb[5].mxu1 }
 0x226   :  { %v252_v37 = vpop.f32.mrb[6].mxu1 }
 0x227   :  { %320 = vst [vmem:[%s498_s5] sm:$0xff] %v319_v34   ;;  %v315_v38 = vpack.c.bf16 %v250_v35, %v250_v35  ;;  %v347_v39 = vpop.f32.mrb[7].mxu1 }
 0x229   :  { %280 = vst [vmem:[%s498_s5 + $0x10] sm:$0xf] %v315_v38 }

// kernel: vit_forward.12
= control target key start
LH: loop header
LB: loop body
LE: loop exit
PB: predicated region body
PF: predicated region fallthrough
CT: control target
= control target key end

     0   :  { %s306_s1 = inlined_call_operand.vmem [shape: bf16[128,128], index: 1, kind: input, shape index: {}]   ;;  %s307_s0 = inlined_call_operand.vmem [shape: bf16[32,128], index: 0, kind: input, shape index: {}]   ;;  %s308_s2 = inlined_call_operand.vmem [shape: f32[1,128], index: 2, kind: input, shape index: {}]   ;;  %s309_s3 = inlined_call_operand.vmem [shape: f32[32,128], index: 3, kind: output, shape index: {}]  }
   0x1   :  { %v231_v0 = vld [vmem:[%s306_s1] sm:$0xff]   ;;  %v232_v1 = vld [vmem:[%s306_s1 + $0x8] sm:$0xff]   ;;  %v233_v2 = vld [vmem:[%s306_s1 + $0x10] sm:$0xff]  }
   0x2   :  { %211 = vmatprep.subr.bf16.mxu0 %v231_v0  ;;  %v234_v3 = vld [vmem:[%s306_s1 + $0x18] sm:$0xff]   ;;  %v239_v4 = vld [vmem:[%s307_s0] sm:$0xff]   ;;  %v236_v6 = vld [vmem:[%s306_s1 + $0x28] sm:$0xff]  }
   0x3   :  { %212 = vmatpush3.bf16.msra.mxu0 %v231_v0  ;;  %227 = vmatprep.mubr.bf16.mxu0 %v239_v4  ;;  %v235_v5 = vld [vmem:[%s306_s1 + $0x20] sm:$0xff]   ;;  %v237_v7 = vld [vmem:[%s306_s1 + $0x30] sm:$0xff]   ;;  %v238_v8 = vld [vmem:[%s306_s1 + $0x38] sm:$0xff]  }
   0x4   :  { %213 = vmatprep.subr.bf16.mxu0 %v232_v1  ;;  %v240_v9 = vld [vmem:[%s307_s0 + $0x8] sm:$0xff]   ;;  %v200_v10 = vld [vmem:[%s308_s2] ss:$0 sm:$0xff] }
   0x7   :  { %214 = vmatpush3.bf16.msra.mxu0 %v232_v1 }
   0x8   :  { %215 = vmatprep.subr.bf16.mxu0 %v233_v2 }
   0xb   :  { %216 = vmatpush3.bf16.msra.mxu0 %v233_v2 }
   0xc   :  { %217 = vmatprep.subr.bf16.mxu0 %v234_v3 }
   0xf   :  { %218 = vmatpush3.bf16.msra.mxu0 %v234_v3 }
  0x10   :  { %219 = vmatprep.subr.bf16.mxu0 %v235_v5 }
  0x13   :  { %220 = vmatpush3.bf16.msra.mxu0 %v235_v5 }
  0x14   :  { %221 = vmatprep.subr.bf16.mxu0 %v236_v6 }
  0x17   :  { %222 = vmatpush3.bf16.msra.mxu0 %v236_v6 }
  0x18   :  { %223 = vmatprep.subr.bf16.mxu0 %v237_v7 }
  0x1b   :  { %224 = vmatpush3.bf16.msra.mxu0 %v237_v7 }
  0x1c   :  { %225 = vmatprep.subr.bf16.mxu0 %v238_v8 }
  0x1f   :  { %226 = vmatpush3.bf16.msra.mxu0 %v238_v8 }
  0x22   :  { %228 = vmatmul.mubr.bf16.vlgmr.msra.gmra.mrb[0].mxu0 %v240_v9 }
  0xf5   :  { %v229_v11 = vpop.f32.mrb[0].mxu0 }
  0xf6   :  { %v180_v12 = vadd.f32 %v229_v11, %v200_v10  ;;  %v141_v13 = vpop.f32.mrb[1].mxu0 }
  0xf7   :  { %v178_v14 = vadd.f32 %v200_v10, %v141_v13  ;;  %v230_v15 = vpop.f32.mrb[2].mxu0 }
  0xf8   :  { %184 = vst [vmem:[%s309_s3 + $0x10] sm:$0xff] %v180_v12  ;;  %v181_v16 = vadd.f32 %v230_v15, %v200_v10  ;;  %v144_v17 = vpop.f32.mrb[3].mxu0 }
  0xf9   :  { %182 = vst [vmem:[%s309_s3] sm:$0xff] %v178_v14  ;;  %v179_v18 = vadd.f32 %v200_v10, %v144_v17 }
  0xfa   :  { %185 = vst [vmem:[%s309_s3 + $0x18] sm:$0xff] %v181_v16 }
  0xfb   :  { %183 = vst [vmem:[%s309_s3 + $0x8] sm:$0xff] %v179_v18 }

// kernel: vit_forward.14
= control target key start
LH: loop header
LB: loop body
LE: loop exit
PB: predicated region body
PF: predicated region fallthrough
CT: control target
= control target key end

     0   :  { %s1347_s6 = smov 0   ;;  %s1349_s7 = smov 0   ;;  %s1522_s0 = inlined_call_operand.vmem [shape: bf16[2,17,96], index: 0, kind: input, shape index: {}]   ;;  %s1523_s1 = inlined_call_operand.vmem [shape: bf16[2,17,32], index: 1, kind: output, shape index: {}]  }
   0x1   :  { %s1351_s8 = smov 0  }
   0x2 LB: > { %s23_s9 = sadd.s32 1, %s1316_s7  ;;  %p1045_p0 = scmp.ge.s32.totalorder %s1320_s8, 1  ;;  %s1320_s8 = sphi %s1351_s8, %s11_s8   ;;  %s1316_s7 = sphi %s1349_s7, %s1525_s7   ;;  %s1312_s6 = sphi %s1347_s6, %s1524_s6  }
   0x3   : > { %p25_p1 = scmp.ge.s32.totalorder %s23_s9, 2  ;;  %p106_p2 = scmp.lt.s32.totalorder %s1320_s8, 3 }
   0x5   : > { %s1527_s9 = smov (%p25_p1, %s23_s9), 0  ;;  %p107_p3 = pnand %p1045_p0, %p106_p2 }
   0x6   : > { %p132_p4 = scmp.lt.s32.totalorder (!%p107_p3), %s1312_s6, 1  ;;  %vm164_vm0 = vcmask (!%p107_p3), 64512   ;;  %s1322_s14 = smov (!%p107_p3), 120   ;;  %vm232_vm1 = vcmask (!%p107_p3), 131072   ;;  %vm225_vm2 = vcmask (!%p107_p3), 138240   ;;  %vm273_vm3 = vcmask (!%p107_p3), 1040384  }
   0x7   : > { %110 = sbr.rel (%p107_p3) target bundleno = 2683 (0xa7b), region = 24  ;;  %s1323_s15 = smov (!%p107_p3), 112   ;;  %v1326_v34 = vmov (!%p107_p3), 0   ;;  %vm343_vm4 = vcmask (!%p107_p3), 57344   ;;  %vm344_vm5 = vsmask.f32 (!%p107_p3), 256 }
   0x8   : > { %s1324_s16 = smov (!%p107_p3), 96   ;;  %s1325_s17 = smov (!%p107_p3), 104   ;;  %v1399_v35 = vsel (!%p107_p3), %vm273_vm3, 65535, %v1326_v34  ;;  %vm345_vm6 = vmand (!%p107_p3), %vm343_vm4, %vm344_vm5  ;;  %vm340_vm7 = vcmask (!%p107_p3), 60416   ;;  %vm547_vm8 = vcmask (!%p107_p3), 122944   ;;  %vm750_vm10 = vcmask (!%p107_p3), 188544  }
   0x9   : > { %s1327_s21 = smov (!%p107_p3), 88   ;;  %s1328_s22 = smov (!%p107_p3), 72   ;;  %vm548_vm9 = vmand (!%p107_p3), %vm547_vm8, %vm344_vm5  ;;  %vm544_vm11 = vcmask (!%p107_p3), 126016   ;;  %vm747_vm13 = vcmask (!%p107_p3), 191616   ;;  %vm953_vm14 = vcmask (!%p107_p3), 254144  }
   0xa   : > { %s1329_s23 = smov (!%p107_p3), 80   ;;  %s1330_s24 = smov (!%p107_p3), 64   ;;  %vm751_vm12 = vmand (!%p107_p3), %vm750_vm10, %vm344_vm5 }
   0xb   : > { %s1331_s25 = smov (!%p107_p3), 48   ;;  %s1332_s26 = smov (!%p107_p3), 56   ;;  %vm954_vm15 = vmand (!%p107_p3), %vm953_vm14, %vm344_vm5 }
   0xc   : > { %s1333_s27 = smov (!%p107_p3), 40   ;;  %s1334_s28 = smov (!%p107_p3), 8  }
   0xd   : > { %s1335_s29 = smov (!%p107_p3), 16   ;;  %s1336_s30 = smov (!%p107_p3), 24  }
   0xe   : > { %s1529_s6 = smov (!%p132_p4, %s1312_s6), 1 }
   0xf   : > { %s1202_s10 = smul.u32 12, %s1529_s6 }
  0x11   : > { %s1373_s13 = scalar_lea.vmem %s1522_s0, %s1202_s10  ;;  %s1415_s20 = scalar_lea.vmem %s1523_s1, %s1202_s10 }
  0x12   : > { %v1242_v0 = vld [vmem:[%s1373_s13] sm:$0xff]   ;;  %v1243_v1 = vld [vmem:[%s1373_s13 + $0x8] ss:$0 sps:$4 sm:$0x11]  }
  0x13   : > { %160 = vrot.lane.b32.xlu0 %v1242_v0, %s1322_s14  ;;  %1134 = vmatprep.mubr.msk.bf16.mxu0 %vm164_vm0, %v1242_v0  ;;  %v1387_v13 = vld [vmem:[%s1373_s13] sm:$0xff]   ;;  %v1394_v30 = vld [vmem:[%s1373_s13 + $0x8] ss:$0 sps:$4 sm:$0x11]  }
  0x14   : > { %v346_v53 = vld [vmem:[%s1415_s20 + $0x8] sm:$0x1] }
  0x17   : > { %162 = vrot.lane.b32.xlu0 %v1243_v1, %s1322_s14 }
  0x85   : > { %v161_v2 = vpop.permute.xlu0 %160 }
  0x86   : > { %1194 = vmatprep.subr.msk.bf16.mxu0 %vm164_vm0, %v161_v2  ;;  %v172_v3 = vsel %vm164_vm0, %v161_v2, 0 }
  0x87   : > { %1131 = vmatpush3.bf16.xpose.msra.mxu0 %v172_v3 }
  0x89   : > { %v163_v4 = vpop.permute.xlu0 %162 }
  0x8a   : > { %1195 = vmatprep.subr.msk.bf16.mxu0 %vm164_vm0, %v163_v4  ;;  %v175_v5 = vsel %vm164_vm0, %v163_v4, 0 }
  0x8f   : > { %1133 = vmatpush3.bf16.xpose.msra.mxu0 %v175_v5 }
  0x96   : > { %1135 = vmatmul.mubr.msk.bf16.vlgmr.msra.gmra.mrb[0].mxu0 %vm164_vm0, %v1243_v1 }
 0x169   : > { %v1136_v6 = vpop.f32.mrb[0].mxu0 }
 0x16a   : > { %v211_v7 = vpop.f32.mrb[1].mxu0  ;;  %v233_v8 = vsel %vm232_vm1, %v1136_v6, -inf }
 0x16b   : > { %234 = vmax.xlane.f32.xlu0 %v233_v8  ;;  %v1137_v9 = vpop.f32.mrb[2].mxu0  ;;  %v226_v10 = vsel %vm225_vm2, %v211_v7, -inf }
 0x16c   : > { %227 = vmax.xlane.f32.xlu1 %v226_v10  ;;  %v214_v11 = vpop.f32.mrb[3].mxu0 }
 0x16d   : > { %v229_v12 = vsel %vm225_vm2, %v214_v11, -inf }
 0x170   : > { %230 = vmax.xlane.f32.xlu1 %v229_v12 }
 0x181   : > { %262 = vrot.lane.b32.xlu1 %v1242_v0, %s1323_s15  ;;  %364 = vrot.lane.b32.xlu0 %v1387_v13, %s1324_s16 }
 0x1f8   : > { %v235_v14 = vpop.xlane.xlu0 %234 }
 0x1f9   : > { %v238_v15 = vsub.f32 %v1136_v6, %v235_v14  ;;  %v228_v16 = vpop.xlane.xlu1 %227 }
 0x1fa   : > { %v236_v17 = vsub.f32 %v211_v7, %v228_v16 }
 0x1fb   : > { %v243_v18 = vmul.f32 1.442695, %v238_v15 }
 0x1fc   : > { %v239_v19 = vmul.f32 1.442695, %v236_v17  ;;  %v365_v38 = vpop.permute.xlu0 %364 }
 0x1fd   : > { %1250 = vpow2.f32 %v243_v18  ;;  %v231_v20 = vpop.xlane.xlu1 %230  ;;  %v375_v47 = vsel %vm164_vm0, %v365_v38, 0 }
 0x1fe   : > { %v237_v21 = vsub.f32 %v214_v11, %v231_v20  ;;  %1252 = vpow2.f32 %v239_v19  ;;  %v1246_v20 = vld [vmem:[%s1373_s13] sm:$0xff]  }
 0x200   : > { %v241_v22 = vmul.f32 1.442695, %v237_v21  ;;  %v1432_v21 = vld [vmem:[%s1373_s13 + $0x8] ss:$0 sps:$4 sm:$0x11]  }
 0x201   : > { %v263_v23 = vpop.permute.xlu1 %262 }
 0x202   : > { %1138 = vmatprep.subr.bf16.mxu1 %v263_v23  ;;  %1254 = vpow2.f32 %v241_v22 }
 0x203   : > { %1139 = vmatpush3.bf16.msra.mxu1 %v263_v23 }
 0x207   : > { %v1251_v24 = vpop.eup %1250 }
 0x208   : > { %v251_v25 = vsel %vm232_vm1, %v1251_v24, 0.0  ;;  %v1253_v26 = vpop.eup %1252 }
 0x209   : > { %252 = vadd.xlane.f32.xlu1 %v251_v25  ;;  %v245_v27 = vsel %vm225_vm2, %v1253_v26, 0.0 }
 0x20c   : > { %v1255_v28 = vpop.eup %1254 }
 0x20d   : > { %246 = vadd.xlane.f32.xlu1 %v245_v27  ;;  %v248_v29 = vsel %vm225_vm2, %v1255_v28, 0.0 }
 0x211   : > { %249 = vadd.xlane.f32.xlu1 %v248_v29 }
 0x222   : > { %264 = vrot.lane.b32.xlu1 %v1243_v1, %s1323_s15 }
 0x226   : > { %366 = vrot.lane.b32.xlu1 %v1394_v30, %s1324_s16 }
 0x22a   : > { %360 = vrot.lane.b32.xlu1 %v1387_v13, %s1325_s17 }
 0x22e   : > { %362 = vrot.lane.b32.xlu1 %v1394_v30, %s1325_s17 }
 0x296   : > { %v253_v31 = vpop.xlane.xlu1 %252 }
 0x297   : > { %1256 = vrcp.f32 %v253_v31 }
 0x29a   : > { %v247_v32 = vpop.xlane.xlu1 %246 }
 0x29b   : > { %1258 = vrcp.f32 %v247_v32 }
 0x29e   : > { %v250_v33 = vpop.xlane.xlu1 %249 }
 0x29f   : > { %1260 = vrcp.f32 %v250_v33 }
 0x2a1   : > { %v1257_v39 = vpop.eup %1256 }
 0x2a2   : > { %v265_v36 = vpop.permute.xlu1 %264  ;;  %v259_v43 = vmul.f32 %v1257_v39, %v1251_v24 }
 0x2a3   : > { %v277_v37 = vand.u32 %v1399_v35, %v265_v36 }
 0x2a4   : > { %v261_v48 = vpack.c.bf16 %v259_v43, %v259_v43 }
 0x2a5   : > { %1140 = vmatprep.subr.bf16.mxu1 %v277_v37  ;;  %v1259_v40 = vpop.eup %1258 }
 0x2a6   : > { %1141 = vmatpush3.bf16.msra.mxu1 %v277_v37  ;;  %v367_v41 = vpop.permute.xlu1 %366  ;;  %v257_v44 = vmul.f32 %v1259_v40, %v1253_v26 }
 0x2a7   : > { %1196 = vmatprep.subr.msk.bf16.mxu1 %vm164_vm0, %v365_v38  ;;  %v378_v50 = vsel %vm164_vm0, %v367_v41, 0 }
 0x2a9   : > { %v1261_v42 = vpop.eup %1260 }
 0x2aa   : > { %v258_v45 = vmul.f32 %v1261_v42, %v1255_v28  ;;  %v361_v49 = vpop.permute.xlu1 %360 }
 0x2ac   : > { %v260_v46 = vpack.c.bf16 %v258_v45, %v257_v44 }
 0x2ae   : > { %1142 = vmatprep.mubr.msk.bf16.mxu1 %vm225_vm2, %v260_v46  ;;  %v363_v51 = vpop.permute.xlu1 %362 }
 0x2af   : > { %1143 = vmatmul.mubr.msk.bf16.vlgmr.msra.gmra.mrb[0].mxu1 %vm225_vm2, %v261_v48 }
 0x2b0   : > { %1147 = vmatpush3.bf16.xpose.msra.mxu1 %v375_v47  ;;  %1150 = vmatprep.mubr.msk.bf16.mxu1 %vm164_vm0, %v361_v49 }
 0x2b1   : > { %1197 = vmatprep.subr.msk.bf16.mxu1 %vm164_vm0, %v367_v41 }
 0x2b8   : > { %1149 = vmatpush3.bf16.xpose.msra.mxu1 %v378_v50 }
 0x2bf   : > { %1151 = vmatmul.mubr.msk.bf16.vlgmr.msra.gmra.mrb[4].mxu1 %vm164_vm0, %v363_v51 }
 0x382   : > { %v1144_v52 = vpop.f32.mrb[0].mxu1 }
 0x383   : > { %v1088_v54 = vpack.c.bf16 %v1144_v52, %v1144_v52  ;;  %v313_v55 = vpop.f32.mrb[1].mxu1 }
 0x384   : > { %v1086_v56 = vpack.c.bf16 %v313_v55, %v313_v55  ;;  %v1145_v57 = vpop.f32.mrb[2].mxu1 }
 0x385   : > { %v347_v58 = vsel %vm345_vm6, %v1088_v54, %v346_v53  ;;  %v316_v59 = vpop.f32.mrb[3].mxu1 }
 0x386   : > { %348 = vst [vmem:[%s1415_s20 + $0x8] sm:$0x1] %v347_v58  ;;  %341 = vst.msk [vmem:[%s1415_s20] sm:$0xf] %vm340_vm7, %v1086_v56  ;;  %v1087_v60 = vpack.c.bf16 %v316_v59, %v316_v59 }
 0x388   : > { %342 = vst.msk [vmem:[%s1415_s20 + $0x4] sm:$0xf] %vm340_vm7, %v1087_v60 }
 0x392   : > { %v1152_v61 = vpop.f32.mrb[4].mxu1 }
 0x393   : > { %v414_v62 = vpop.f32.mrb[5].mxu1  ;;  %v434_v3 = vsel %vm232_vm1, %v1152_v61, -inf }
 0x394   : > { %v1153_v63 = vpop.f32.mrb[6].mxu1  ;;  %v428_v0 = vsel %vm225_vm2, %v414_v62, -inf }
 0x395   : > { %429 = vmax.xlane.f32.xlu1 %v428_v0  ;;  %v417_v1 = vpop.f32.mrb[7].mxu1 }
 0x396   : > { %v431_v2 = vsel %vm225_vm2, %v417_v1, -inf }
 0x397   : > { %432 = vmax.xlane.f32.xlu0 %v431_v2 }
 0x399   : > { %435 = vmax.xlane.f32.xlu1 %v434_v3 }
 0x3aa   : > { %463 = vrot.lane.b32.xlu1 %v1387_v13, %s1327_s21 }
 0x422   : > { %v430_v4 = vpop.xlane.xlu1 %429 }
 0x423   : > { %v437_v6 = vsub.f32 %v414_v62, %v430_v4 }
 0x424   : > { %v433_v5 = vpop.xlane.xlu0 %432 }
 0x425   : > { %v438_v7 = vsub.f32 %v417_v1, %v433_v5  ;;  %v440_v11 = vmul.f32 1.442695, %v437_v6  ;;  %v1461_v5 = vld [vmem:[%s1373_s13] sm:$0xff]   ;;  %v1465_v6 = vld [vmem:[%s1373_s13 + $0x8] ss:$0 sps:$4 sm:$0x11]  }
 0x426   : > { %v436_v8 = vpop.xlane.xlu1 %435 }
 0x427   : > { %v442_v9 = vmul.f32 1.442695, %v438_v7  ;;  %v439_v10 = vsub.f32 %v1152_v61, %v436_v8 }
 0x429   : > { %1262 = vpow2.f32 %v442_v9  ;;  %v444_v12 = vmul.f32 1.442695, %v439_v10 }
 0x42a   : > { %v464_v14 = vpop.permute.xlu1 %463 }
 0x42b   : > { %1264 = vpow2.f32 %v444_v12  ;;  %1154 = vmatprep.subr.bf16.mxu0 %v464_v14 }
 0x42c   : > { %1155 = vmatpush3.bf16.msra.mxu0 %v464_v14  ;;  %1266 = vpow2.f32 %v440_v11 }
 0x433   : > { %v1263_v15 = vpop.eup %1262 }
 0x434   : > { %v449_v13 = vsel %vm225_vm2, %v1263_v15, 0.0 }
 0x435   : > { %v1265_v16 = vpop.eup %1264  ;;  %450 = vadd.xlane.f32.xlu1 %v449_v13 }
 0x436   : > { %v452_v17 = vsel %vm232_vm1, %v1265_v16, 0.0  ;;  %v1267_v18 = vpop.eup %1266 }
 0x437   : > { %453 = vadd.xlane.f32.xlu0 %v452_v17  ;;  %v446_v19 = vsel %vm225_vm2, %v1267_v18, 0.0 }
 0x43b   : > { %447 = vadd.xlane.f32.xlu0 %v446_v19 }
 0x446   : > { %567 = vrot.lane.b32.xlu1 %v1246_v20, %s1328_s22 }
 0x44a   : > { %569 = vrot.lane.b32.xlu1 %v1432_v21, %s1328_s22 }
 0x44e   : > { %565 = vrot.lane.b32.xlu1 %v1432_v21, %s1329_s23 }
 0x451   : > { %465 = vrot.lane.b32.xlu0 %v1394_v30, %s1327_s21 }
 0x455   : > { %563 = vrot.lane.b32.xlu0 %v1246_v20, %s1329_s23 }
 0x4c2   : > { %v451_v22 = vpop.xlane.xlu1 %450 }
 0x4c4   : > { %v454_v23 = vpop.xlane.xlu0 %453 }
 0x4c5   : > { %1268 = vrcp.f32 %v454_v23 }
 0x4c6   : > { %1270 = vrcp.f32 %v451_v22  ;;  %v568_v27 = vpop.permute.xlu1 %567 }
 0x4c7   : > { %v578_v36 = vsel %vm164_vm0, %v568_v27, 0 }
 0x4c8   : > { %v448_v24 = vpop.xlane.xlu0 %447 }
 0x4c9   : > { %1272 = vrcp.f32 %v448_v24 }
 0x4ca   : > { %v570_v39 = vpop.permute.xlu1 %569 }
 0x4cb   : > { %v581_v40 = vsel %vm164_vm0, %v570_v39, 0 }
 0x4cc   : > { %v466_v25 = vpop.permute.xlu0 %465 }
 0x4cd   : > { %v475_v26 = vand.u32 %v466_v25, %v1399_v35 }
 0x4ce   : > { %v566_v41 = vpop.permute.xlu1 %565 }
 0x4cf   : > { %1156 = vmatprep.subr.bf16.mxu0 %v475_v26  ;;  %v1269_v28 = vpop.eup %1268 }
 0x4d0   : > { %1157 = vmatpush3.bf16.msra.mxu0 %v475_v26  ;;  %v1271_v29 = vpop.eup %1270  ;;  %v460_v32 = vmul.f32 %v1269_v28, %v1265_v16  ;;  %v564_v38 = vpop.permute.xlu0 %563 }
 0x4d1   : > { %1198 = vmatprep.subr.msk.bf16.mxu0 %vm164_vm0, %v568_v27  ;;  %v459_v33 = vmul.f32 %v1271_v29, %v1263_v15 }
 0x4d2   : > { %v462_v37 = vpack.c.bf16 %v460_v32, %v460_v32 }
 0x4d3   : > { %v1273_v31 = vpop.eup %1272 }
 0x4d4   : > { %v458_v30 = vmul.f32 %v1273_v31, %v1267_v18 }
 0x4d6   : > { %v461_v34 = vpack.c.bf16 %v459_v33, %v458_v30 }
 0x4d8   : > { %1158 = vmatprep.mubr.msk.bf16.mxu0 %vm225_vm2, %v461_v34 }
 0x4d9   : > { %1159 = vmatmul.mubr.msk.bf16.vlgmr.msra.gmra.mrb[4].mxu0 %vm225_vm2, %v462_v37 }
 0x4da   : > { %1163 = vmatpush3.bf16.xpose.msra.mxu0 %v578_v36  ;;  %1166 = vmatprep.mubr.msk.bf16.mxu0 %vm164_vm0, %v564_v38 }
 0x4db   : > { %1199 = vmatprep.subr.msk.bf16.mxu0 %vm164_vm0, %v570_v39 }
 0x4e2   : > { %1165 = vmatpush3.bf16.xpose.msra.mxu0 %v581_v40 }
 0x4e9   : > { %1167 = vmatmul.mubr.msk.bf16.vlgmr.msra.gmra.mrb[8].mxu0 %vm164_vm0, %v566_v41 }
 0x5ac   : > { %v1447_v42 = vpop.f32.mrb[4].mxu0 }
 0x5ad   : > { %v1449_v43 = vpop.f32.mrb[5].mxu0 }
 0x5ae   : > { %v1161_v44 = vpop.f32.mrb[6].mxu0 }
 0x5af   : > { %v1451_v45 = vpop.f32.mrb[7].mxu0 }
 0x5bc   : > { %v1168_v46 = vpop.f32.mrb[8].mxu0 }
 0x5bd   : > { %v617_v47 = vpop.f32.mrb[9].mxu0  ;;  %v637_v52 = vsel %vm232_vm1, %v1168_v46, -inf }
 0x5be   : > { %v1169_v48 = vpop.f32.mrb[10].mxu0  ;;  %v631_v49 = vsel %vm225_vm2, %v617_v47, -inf }
 0x5bf   : > { %632 = vmax.xlane.f32.xlu0 %v631_v49  ;;  %v620_v50 = vpop.f32.mrb[11].mxu0 }
 0x5c0   : > { %v634_v51 = vsel %vm225_vm2, %v620_v50, -inf }
 0x5c1   : > { %635 = vmax.xlane.f32.xlu1 %v634_v51 }
 0x5c3   : > { %638 = vmax.xlane.f32.xlu0 %v637_v52 }
 0x5d2   : > { %666 = vrot.lane.b32.xlu1 %v1246_v20, %s1330_s24 }
 0x64c   : > { %v633_v53 = vpop.xlane.xlu0 %632 }
 0x64d   : > { %v640_v55 = vsub.f32 %v617_v47, %v633_v53 }
 0x64e   : > { %v636_v54 = vpop.xlane.xlu1 %635 }
 0x64f   : > { %v641_v56 = vsub.f32 %v620_v50, %v636_v54  ;;  %v643_v61 = vmul.f32 1.442695, %v640_v55 }
 0x650   : > { %v639_v57 = vpop.xlane.xlu0 %638 }
 0x651   : > { %v645_v58 = vmul.f32 1.442695, %v641_v56  ;;  %v642_v59 = vsub.f32 %v1168_v46, %v639_v57  ;;  %v1091_v56 = vpack.c.bf16 %v1447_v42, %v1447_v42 }
 0x652   : > { %v667_v60 = vpop.permute.xlu1 %666 }
 0x653   : > { %1274 = vpow2.f32 %v645_v58  ;;  %v647_v62 = vmul.f32 1.442695, %v642_v59  ;;  %1170 = vmatprep.subr.bf16.mxu1 %v667_v60  ;;  %v1090_v58 = vpack.c.bf16 %v1451_v45, %v1451_v45  ;;  %v1089_v59 = vpack.c.bf16 %v1449_v43, %v1449_v43  ;;  %v549_v43 = vld [vmem:[%s1415_s20 + $0x8] sm:$0x1] }
 0x654   : > { %1171 = vmatpush3.bf16.msra.mxu1 %v667_v60 }
 0x655   : > { %1276 = vpow2.f32 %v647_v62 }
 0x656   : > { %1278 = vpow2.f32 %v643_v61 }
 0x65d   : > { %v1275_v63 = vpop.eup %1274 }
 0x65e   : > { %v652_v0 = vsel %vm225_vm2, %v1275_v63, 0.0 }
 0x65f   : > { %v1277_v1 = vpop.eup %1276  ;;  %653 = vadd.xlane.f32.xlu1 %v652_v0 }
 0x660   : > { %v655_v2 = vsel %vm232_vm1, %v1277_v1, 0.0  ;;  %v1279_v3 = vpop.eup %1278 }
 0x661   : > { %656 = vadd.xlane.f32.xlu0 %v655_v2  ;;  %v649_v4 = vsel %vm225_vm2, %v1279_v3, 0.0 }
 0x665   : > { %650 = vadd.xlane.f32.xlu0 %v649_v4 }
 0x670   : > { %770 = vrot.lane.b32.xlu1 %v1461_v5, %s1331_s25 }
 0x674   : > { %772 = vrot.lane.b32.xlu1 %v1465_v6, %s1331_s25 }
 0x678   : > { %768 = vrot.lane.b32.xlu1 %v1465_v6, %s1332_s26 }
 0x67b   : > { %668 = vrot.lane.b32.xlu0 %v1432_v21, %s1330_s24 }
 0x67f   : > { %766 = vrot.lane.b32.xlu0 %v1461_v5, %s1332_s26 }
 0x6ec   : > { %v654_v7 = vpop.xlane.xlu1 %653 }
 0x6ee   : > { %v657_v8 = vpop.xlane.xlu0 %656 }
 0x6ef   : > { %1280 = vrcp.f32 %v657_v8 }
 0x6f0   : > { %1282 = vrcp.f32 %v654_v7  ;;  %v771_v12 = vpop.permute.xlu1 %770 }
 0x6f1   : > { %v781_v20 = vsel %vm164_vm0, %v771_v12, 0 }
 0x6f2   : > { %v651_v9 = vpop.xlane.xlu0 %650 }
 0x6f3   : > { %1284 = vrcp.f32 %v651_v9 }
 0x6f4   : > { %v773_v23 = vpop.permute.xlu1 %772 }
 0x6f5   : > { %v784_v24 = vsel %vm164_vm0, %v773_v23, 0 }
 0x6f6   : > { %v669_v10 = vpop.permute.xlu0 %668 }
 0x6f7   : > { %v678_v11 = vand.u32 %v669_v10, %v1399_v35 }
 0x6f8   : > { %v769_v25 = vpop.permute.xlu1 %768 }
 0x6f9   : > { %1172 = vmatprep.subr.bf16.mxu1 %v678_v11  ;;  %v1281_v14 = vpop.eup %1280 }
 0x6fa   : > { %1173 = vmatpush3.bf16.msra.mxu1 %v678_v11  ;;  %v1283_v15 = vpop.eup %1282  ;;  %v663_v16 = vmul.f32 %v1281_v14, %v1277_v1  ;;  %v767_v22 = vpop.permute.xlu0 %766 }
 0x6fb   : > { %1200 = vmatprep.subr.msk.bf16.mxu1 %vm164_vm0, %v771_v12  ;;  %v662_v18 = vmul.f32 %v1283_v15, %v1275_v63 }
 0x6fc   : > { %v665_v21 = vpack.c.bf16 %v663_v16, %v663_v16 }
 0x6fd   : > { %v1285_v13 = vpop.eup %1284 }
 0x6fe   : > { %v661_v17 = vmul.f32 %v1285_v13, %v1279_v3 }
 0x700   : > { %v664_v19 = vpack.c.bf16 %v662_v18, %v661_v17 }
 0x702   : > { %1174 = vmatprep.mubr.msk.bf16.mxu1 %vm225_vm2, %v664_v19 }
 0x703   : > { %1175 = vmatmul.mubr.msk.bf16.vlgmr.msra.gmra.mrb[8].mxu1 %vm225_vm2, %v665_v21 }
 0x704   : > { %1179 = vmatpush3.bf16.xpose.msra.mxu1 %v781_v20  ;;  %1182 = vmatprep.mubr.msk.bf16.mxu1 %vm164_vm0, %v767_v22 }
 0x705   : > { %1201 = vmatprep.subr.msk.bf16.mxu1 %vm164_vm0, %v773_v23 }
 0x70c   : > { %1181 = vmatpush3.bf16.xpose.msra.mxu1 %v784_v24 }
 0x713   : > { %1183 = vmatmul.mubr.msk.bf16.vlgmr.msra.gmra.mrb[12].mxu1 %vm164_vm0, %v769_v25  ;;  %vm950_vm0 = vcmask 257216  }
 0x7d6   : > { %v1176_v26 = vpop.f32.mrb[8].mxu1 }
 0x7d7   : > { %v714_v27 = vpop.f32.mrb[9].mxu1  ;;  %v1094_v57 = vpack.c.bf16 %v1176_v26, %v1176_v26 }
 0x7d8   : > { %v1177_v28 = vpop.f32.mrb[10].mxu1  ;;  %v1092_v61 = vpack.c.bf16 %v714_v27, %v714_v27 }
 0x7d9   : > { %v717_v29 = vpop.f32.mrb[11].mxu1 }
 0x7da   : > { %v1093_v60 = vpack.c.bf16 %v717_v29, %v717_v29 }
 0x7e6   : > { %v1184_v31 = vpop.f32.mrb[12].mxu1 }
 0x7e7   : > { %v820_v32 = vpop.f32.mrb[13].mxu1  ;;  %v840_v37 = vsel %vm232_vm1, %v1184_v31, -inf }
 0x7e8   : > { %v1185_v30 = vpop.f32.mrb[14].mxu1  ;;  %v834_v33 = vsel %vm225_vm2, %v820_v32, -inf }
 0x7e9   : > { %835 = vmax.xlane.f32.xlu0 %v834_v33  ;;  %v823_v34 = vpop.f32.mrb[15].mxu1 }
 0x7ea   : > { %v837_v36 = vsel %vm225_vm2, %v823_v34, -inf }
 0x7eb   : > { %838 = vmax.xlane.f32.xlu1 %v837_v36 }
 0x7ed   : > { %841 = vmax.xlane.f32.xlu0 %v840_v37 }
 0x876   : > { %v836_v38 = vpop.xlane.xlu0 %835 }
 0x877   : > { %v843_v40 = vsub.f32 %v820_v32, %v836_v38 }
 0x878   : > { %v839_v39 = vpop.xlane.xlu1 %838 }
 0x879   : > { %v844_v41 = vsub.f32 %v823_v34, %v839_v39  ;;  %v846_v48 = vmul.f32 1.442695, %v843_v40 }
 0x87a   : > { %v842_v44 = vpop.xlane.xlu0 %841 }
 0x87b   : > { %v848_v46 = vmul.f32 1.442695, %v844_v41  ;;  %v845_v47 = vsub.f32 %v1184_v31, %v842_v44 }
 0x87d   : > { %1286 = vpow2.f32 %v848_v46  ;;  %v850_v49 = vmul.f32 1.442695, %v845_v47 }
 0x87f   : > { %1288 = vpow2.f32 %v850_v49 }
 0x880   : > { %1290 = vpow2.f32 %v846_v48 }
 0x887   : > { %v1287_v50 = vpop.eup %1286 }
 0x888   : > { %v855_v51 = vsel %vm225_vm2, %v1287_v50, 0.0 }
 0x889   : > { %v1289_v52 = vpop.eup %1288  ;;  %856 = vadd.xlane.f32.xlu1 %v855_v51 }
 0x88a   : > { %v858_v53 = vsel %vm232_vm1, %v1289_v52, 0.0  ;;  %v1291_v54 = vpop.eup %1290 }
 0x88b   : > { %859 = vadd.xlane.f32.xlu0 %v858_v53  ;;  %v852_v55 = vsel %vm225_vm2, %v1291_v54, 0.0 }
 0x88f   : > { %853 = vadd.xlane.f32.xlu0 %v852_v55 }
 0x89a   : > { %869 = vrot.lane.b32.xlu1 %v1461_v5, %s1333_s27 }
 0x89e   : > { %539 = vrot.lane.b32.xlu1 %v1091_v56, %s1334_s28 }
 0x8a2   : > { %742 = vrot.lane.b32.xlu1 %v1094_v57, %s1335_s29 }
 0x8a5   : > { %871 = vrot.lane.b32.xlu0 %v1465_v6, %s1333_s27 }
 0x8a6   : > { %537 = vrot.lane.b32.xlu1 %v1090_v58, %s1334_s28 }
 0x8a9   : > { %535 = vrot.lane.b32.xlu0 %v1089_v59, %s1334_s28 }
 0x8aa   : > { %740 = vrot.lane.b32.xlu1 %v1093_v60, %s1335_s29 }
 0x8ad   : > { %738 = vrot.lane.b32.xlu0 %v1092_v61, %s1335_s29 }
 0x916   : > { %v857_v42 = vpop.xlane.xlu1 %856 }
 0x918   : > { %v860_v62 = vpop.xlane.xlu0 %859 }
 0x919   : > { %1292 = vrcp.f32 %v860_v62 }
 0x91a   : > { %v870_v63 = vpop.permute.xlu1 %869  ;;  %1294 = vrcp.f32 %v857_v42 }
 0x91b   : > { %1186 = vmatprep.subr.bf16.mxu0 %v870_v63 }
 0x91c   : > { %v854_v45 = vpop.xlane.xlu0 %853  ;;  %1187 = vmatpush3.bf16.msra.mxu0 %v870_v63 }
 0x91d   : > { %1296 = vrcp.f32 %v854_v45 }
 0x91e   : > { %v540_v0 = vpop.permute.xlu1 %539 }
 0x91f   : > { %v550_v1 = vsel %vm548_vm9, %v540_v0, %v549_v43 }
 0x920   : > { %551 = vst [vmem:[%s1415_s20 + $0x8] sm:$0x1] %v550_v1  ;;  %v872_v2 = vpop.permute.xlu0 %871 }
 0x921   : > { %v881_v3 = vand.u32 %v872_v2, %v1399_v35 }
 0x922   : > { %v743_v4 = vpop.permute.xlu1 %742 }
 0x923   : > { %1188 = vmatprep.subr.bf16.mxu0 %v881_v3  ;;  %v1293_v5 = vpop.eup %1292 }
 0x924   : > { %v536_v6 = vpop.permute.xlu0 %535  ;;  %1189 = vmatpush3.bf16.msra.mxu0 %v881_v3  ;;  %v1295_v7 = vpop.eup %1294  ;;  %v866_v10 = vmul.f32 %v1293_v5, %v1289_v52 }
 0x925   : > { %545 = vst.msk [vmem:[%s1415_s20] sm:$0xf] %vm544_vm11, %v536_v6  ;;  %v865_v15 = vmul.f32 %v1295_v7, %v1287_v50 }
 0x926   : > { %v538_v8 = vpop.permute.xlu1 %537  ;;  %v868_v17 = vpack.c.bf16 %v866_v10, %v866_v10 }
 0x927   : > { %v1297_v9 = vpop.eup %1296  ;;  %v752_v35 = vld [vmem:[%s1415_s20 + $0x8] sm:$0x1]  ;;  %546 = vst.msk [vmem:[%s1415_s20 + $0x4] sm:$0xf] %vm544_vm11, %v538_v8 }
 0x928   : > { %v753_v11 = vsel %vm751_vm12, %v743_v4, %v752_v35  ;;  %v739_v12 = vpop.permute.xlu0 %738  ;;  %v864_v14 = vmul.f32 %v1297_v9, %v1291_v54 }
 0x929   : > { %754 = vst [vmem:[%s1415_s20 + $0x8] sm:$0x1] %v753_v11  ;;  %748 = vst.msk [vmem:[%s1415_s20] sm:$0xf] %vm747_vm13, %v739_v12 }
 0x92a   : > { %v741_v13 = vpop.permute.xlu1 %740  ;;  %v867_v16 = vpack.c.bf16 %v865_v15, %v864_v14 }
 0x92b   : > { %749 = vst.msk [vmem:[%s1415_s20 + $0x4] sm:$0xf] %vm747_vm13, %v741_v13 }
 0x92c   : > { %1190 = vmatprep.mubr.msk.bf16.mxu0 %vm225_vm2, %v867_v16 }
 0x92d   : > { %1191 = vmatmul.mubr.msk.bf16.vlgmr.msra.gmra.mrb[12].mxu0 %vm225_vm2, %v868_v17 }
 0x930   : > { %v955_v26 = vld [vmem:[%s1415_s20 + $0x8] sm:$0x1] }
 0xa00   : > { %v1192_v18 = vpop.f32.mrb[12].mxu0 }
 0xa01   : > { %v1097_v19 = vpack.c.bf16 %v1192_v18, %v1192_v18  ;;  %v917_v20 = vpop.f32.mrb[13].mxu0 }
 0xa02   : > { %v1095_v21 = vpack.c.bf16 %v917_v20, %v917_v20  ;;  %v1193_v22 = vpop.f32.mrb[14].mxu0 }
 0xa03   : > { %945 = vrot.lane.b32.xlu0 %v1097_v19, %s1336_s30  ;;  %v920_v23 = vpop.f32.mrb[15].mxu0 }
 0xa04   : > { %v1096_v24 = vpack.c.bf16 %v920_v23, %v920_v23  ;;  %941 = vrot.lane.b32.xlu1 %v1095_v21, %s1336_s30 }
 0xa07   : > { %943 = vrot.lane.b32.xlu0 %v1096_v24, %s1336_s30 }
 0xa75   : > { %v946_v25 = vpop.permute.xlu0 %945 }
 0xa76   : > { %v956_v27 = vsel %vm954_vm15, %v946_v25, %v955_v26  ;;  %v942_v28 = vpop.permute.xlu1 %941 }
 0xa77   : > { %957 = vst [vmem:[%s1415_s20 + $0x8] sm:$0x1] %v956_v27  ;;  %951 = vst.msk [vmem:[%s1415_s20] sm:$0xf] %vm950_vm0, %v942_v28 }
 0xa79   : > { %v944_v29 = vpop.permute.xlu0 %943 }
 0xa7a   : > { %952 = vst.msk [vmem:[%s1415_s20 + $0x4] sm:$0xf] %vm950_vm0, %v944_v29 }
 0xa7b PF: > { %s11_s8 = sadd.s32 1, %s1320_s8   ;;  %s1524_s6 = smov %s1316_s7 }
 0xa7c   : > { %p8_p5 = scmp.ge.s32.totalorder %s11_s8, 4   ;;  %s1525_s7 = smov %s1527_s9 }
 0xa7e   :  { %10 = sbr.rel (!%p8_p5) target bundleno = 2 (0x2), region = 54 }

// kernel: vit_forward.15
= control target key start
LH: loop header
LB: loop body
LE: loop exit
PB: predicated region body
PF: predicated region fallthrough
CT: control target
= control target key end

     0   :  { %v302_v0 = vmov 0.0   ;;  %vm303_vm0 = vmmov 0   ;;  %s398_s1 = inlined_call_operand.vmem [shape: bf16[128,128], index: 1, kind: input, shape index: {}]   ;;  %s399_s0 = inlined_call_operand.vmem [shape: bf16[40,128], index: 0, kind: input, shape index: {}]   ;;  %s400_s2 = inlined_call_operand.vmem [shape: f32[1,128], index: 2, kind: input, shape index: {}]   ;;  %s401_s3 = inlined_call_operand.vmem [shape: f32[40,128], index: 3, kind: input, shape index: {}]   ;;  %s402_s4 = inlined_call_operand.vmem [shape: f32[40,128], index: 4, kind: output, shape index: {}]  }
   0x1   :  { %273 = vmatprep.subr.bf16.mxu1 %v302_v0  ;;  %v291_v1 = vld [vmem:[%s398_s1] sm:$0xff]   ;;  %245 = vmatprep.subr.bf16.mxu0 %v302_v0  ;;  %v292_v2 = vld [vmem:[%s398_s1 + $0x8] sm:$0xff]   ;;  %v293_v3 = vld [vmem:[%s398_s1 + $0x10] sm:$0xff]  }
   0x2   :  { %265 = vmatprep.mubr.msk.bf16.mxu1 %vm303_vm0, %v302_v0  ;;  %261 = vmatprep.mubr.msk.bf16.mxu0 %vm303_vm0, %v302_v0  ;;  %v294_v4 = vld [vmem:[%s398_s1 + $0x18] sm:$0xff]   ;;  %v295_v5 = vld [vmem:[%s398_s1 + $0x20] sm:$0xff]   ;;  %v296_v6 = vld [vmem:[%s398_s1 + $0x28] sm:$0xff]  }
   0x3   :  { %281 = vmatpush3.bf16.msra.mxu1 %v291_v1  ;;  %246 = vmatpush3.bf16.msra.mxu0 %v291_v1  ;;  %v297_v7 = vld [vmem:[%s398_s1 + $0x30] sm:$0xff]   ;;  %v298_v8 = vld [vmem:[%s398_s1 + $0x38] sm:$0xff]   ;;  %v299_v9 = vld [vmem:[%s399_s0 + $0x8] sm:$0xff]  }
   0x4   :  { %274 = vmatprep.subr.bf16.mxu1 %v302_v0  ;;  %247 = vmatprep.subr.bf16.mxu0 %v302_v0  ;;  %v300_v10 = vld [vmem:[%s399_s0] sm:$0xff]   ;;  %v301_v11 = vld [vmem:[%s399_s0 + $0x10] ss:$0 sps:$4 sm:$0xff]   ;;  %v206_v22 = vld [vmem:[%s401_s3 + $0x18] sm:$0xff] }
   0x5   :  { %v233_v12 = vld [vmem:[%s400_s2] ss:$0 sm:$0xff]  ;;  %v205_v14 = vld [vmem:[%s401_s3 + $0x10] sm:$0xff]  ;;  %v204_v24 = vld [vmem:[%s401_s3 + $0x8] sm:$0xff] }
   0x6   :  { %v203_v16 = vld [vmem:[%s401_s3] sm:$0xff] }
   0x7   :  { %282 = vmatpush3.bf16.msra.mxu1 %v292_v2  ;;  %248 = vmatpush3.bf16.msra.mxu0 %v292_v2  ;;  %v207_v34 = vld [vmem:[%s401_s3 + $0x20] sm:$0xff] }
   0x8   :  { %275 = vmatprep.subr.bf16.mxu1 %v302_v0  ;;  %249 = vmatprep.subr.bf16.mxu0 %v302_v0 }
   0xb   :  { %283 = vmatpush3.bf16.msra.mxu1 %v293_v3  ;;  %250 = vmatpush3.bf16.msra.mxu0 %v293_v3 }
   0xc   :  { %276 = vmatprep.subr.bf16.mxu1 %v302_v0  ;;  %251 = vmatprep.subr.bf16.mxu0 %v302_v0 }
   0xf   :  { %284 = vmatpush3.bf16.msra.mxu1 %v294_v4  ;;  %252 = vmatpush3.bf16.msra.mxu0 %v294_v4 }
  0x10   :  { %277 = vmatprep.subr.bf16.mxu1 %v302_v0  ;;  %253 = vmatprep.subr.bf16.mxu0 %v302_v0 }
  0x13   :  { %285 = vmatpush3.bf16.msra.mxu1 %v295_v5  ;;  %254 = vmatpush3.bf16.msra.mxu0 %v295_v5 }
  0x14   :  { %278 = vmatprep.subr.bf16.mxu1 %v302_v0  ;;  %255 = vmatprep.subr.bf16.mxu0 %v302_v0 }
  0x17   :  { %286 = vmatpush3.bf16.msra.mxu1 %v296_v6  ;;  %256 = vmatpush3.bf16.msra.mxu0 %v296_v6 }
  0x18   :  { %279 = vmatprep.subr.bf16.mxu1 %v302_v0  ;;  %257 = vmatprep.subr.bf16.mxu0 %v302_v0 }
  0x1b   :  { %287 = vmatpush3.bf16.msra.mxu1 %v297_v7  ;;  %258 = vmatpush3.bf16.msra.mxu0 %v297_v7 }
  0x1c   :  { %280 = vmatprep.subr.bf16.mxu1 %v302_v0  ;;  %259 = vmatprep.subr.bf16.mxu0 %v302_v0 }
  0x1f   :  { %288 = vmatpush3.bf16.msra.mxu1 %v298_v8  ;;  %260 = vmatpush3.bf16.msra.mxu0 %v298_v8 }
  0x22   :  { %266 = vmatmul.mubr.bf16.vlgmr.msra.gmra.mrb[0].mxu1 %v299_v9  ;;  %262 = vmatmul.mubr.bf16.vlgmr.msra.gmra.mrb[0].mxu0 %v300_v10 }
  0x23   :  { %269 = vmatprep.mubr.msk.bf16.mxu1 %vm303_vm0, %v302_v0 }
  0x2a   :  { %270 = vmatmul.mubr.bf16.gmra.mrb[4].mxu1 %v301_v11 }
  0xf5   :  { %v159_v13 = vpop.f32.mrb[0].mxu1  ;;  %v151_v15 = vpop.f32.mrb[0].mxu0 }
  0xf6   :  { %v200_v17 = vadd.f32 %v233_v12, %v159_v13  ;;  %v267_v18 = vpop.f32.mrb[1].mxu1  ;;  %v198_v19 = vadd.f32 %v233_v12, %v151_v15  ;;  %v263_v20 = vpop.f32.mrb[1].mxu0 }
  0xf7   :  { %v162_v21 = vpop.f32.mrb[2].mxu1  ;;  %v154_v23 = vpop.f32.mrb[2].mxu0 }
  0xf8   :  { %v210_v25 = vadd.f32 %v205_v14, %v200_v17  ;;  %v201_v26 = vadd.f32 %v233_v12, %v162_v21  ;;  %v208_v27 = vadd.f32 %v203_v16, %v198_v19  ;;  %v268_v28 = vpop.f32.mrb[3].mxu1  ;;  %v199_v29 = vadd.f32 %v233_v12, %v154_v23  ;;  %v264_v30 = vpop.f32.mrb[3].mxu0 }
  0xfa   :  { %215 = vst [vmem:[%s402_s4 + $0x10] sm:$0xff] %v210_v25  ;;  %v211_v31 = vadd.f32 %v206_v22, %v201_v26  ;;  %213 = vst [vmem:[%s402_s4] sm:$0xff] %v208_v27  ;;  %v209_v32 = vadd.f32 %v204_v24, %v199_v29 }
  0xfc   :  { %216 = vst [vmem:[%s402_s4 + $0x18] sm:$0xff] %v211_v31  ;;  %214 = vst [vmem:[%s402_s4 + $0x8] sm:$0xff] %v209_v32 }
  0xfd   :  { %v167_v33 = vpop.f32.mrb[4].mxu1 }
  0xfe   :  { %v202_v35 = vadd.f32 %v233_v12, %v167_v33  ;;  %v271_v36 = vpop.f32.mrb[5].mxu1 }
  0xff   :  { %v170_v37 = vpop.f32.mrb[6].mxu1 }
 0x100   :  { %v212_v38 = vadd.f32 %v207_v34, %v202_v35  ;;  %v272_v39 = vpop.f32.mrb[7].mxu1 }
 0x102   :  { %217 = vst [vmem:[%s402_s4 + $0x20] sm:$0xff] %v212_v38 }

// kernel: vit_forward.16
= control target key start
LH: loop header
LB: loop body
LE: loop exit
PB: predicated region body
PF: predicated region fallthrough
CT: control target
= control target key end

     0   :  { %vm30_vm0 = vcmask 261120   ;;  %v404_v36 = vmov 0.0   ;;  %vm405_vm1 = vmmov 0   ;;  %vm142_vm2 = vcmask 257024   ;;  %s528_s0 = inlined_call_operand.vmem [shape: f32[40,32], index: 0, kind: input, shape index: {}]   ;;  %s529_s3 = inlined_call_operand.vmem [shape: bf16[32,128], index: 3, kind: input, shape index: {}]   ;;  %s530_s1 = inlined_call_operand.vmem [shape: f32[1,32], index: 1, kind: input, shape index: {}]   ;;  %s531_s2 = inlined_call_operand.vmem [shape: f32[1,32], index: 2, kind: input, shape index: {}]   ;;  %s532_s4 = inlined_call_operand.vmem [shape: f32[1,128], index: 4, kind: input, shape index: {}]   ;;  %s533_s5 = inlined_call_operand.vmem [shape: bf16[40,128], index: 5, kind: output, shape index: {}]  }
   0x1   :  { %v27_v0 = vld [vmem:[%s528_s0 + $0x10] sm:$0xff]  ;;  %v28_v1 = vld [vmem:[%s528_s0 + $0x18] sm:$0xff]  ;;  %v25_v2 = vld [vmem:[%s528_s0] sm:$0xff]  ;;  %373 = vmatprep.subr.bf16.mxu1 %v404_v36  ;;  %357 = vmatprep.subr.bf16.mxu0 %v404_v36 }
   0x2   :  { %v37_v3 = vsel %vm30_vm0, %v27_v0, 0.0  ;;  %v31_v4 = vsel %vm30_vm0, %v25_v2, 0.0  ;;  %v26_v5 = vld [vmem:[%s528_s0 + $0x8] sm:$0xff]  ;;  %v40_v6 = vsel %vm30_vm0, %v28_v1, 0.0  ;;  %v29_v8 = vld [vmem:[%s528_s0 + $0x20] sm:$0xff]  ;;  %365 = vmatprep.mubr.msk.bf16.mxu1 %vm405_vm1, %v404_v36  ;;  %361 = vmatprep.mubr.msk.bf16.mxu0 %vm405_vm1, %v404_v36 }
   0x3   :  { %38 = vadd.xlane.f32.xlu0 %v37_v3  ;;  %32 = vadd.xlane.f32.xlu1 %v31_v4  ;;  %v34_v7 = vsel %vm30_vm0, %v26_v5, 0.0  ;;  %v43_v9 = vsel %vm30_vm0, %v29_v8, 0.0  ;;  %v379_v35 = vld [vmem:[%s529_s3] sm:$0xff]   ;;  %v380_v37 = vld [vmem:[%s529_s3 + $0x8] sm:$0xff]  }
   0x4   :  { %375 = vmatpush3.bf16.msra.mxu1 %v379_v35  ;;  %358 = vmatpush3.bf16.msra.mxu0 %v379_v35  ;;  %v310_v54 = vld [vmem:[%s530_s1] ss:$0 sm:$0xff] }
   0x5   :  { %374 = vmatprep.subr.bf16.mxu1 %v404_v36  ;;  %359 = vmatprep.subr.bf16.mxu0 %v404_v36  ;;  %v311_v56 = vld [vmem:[%s531_s2] ss:$0 sm:$0xff] }
   0x7   :  { %41 = vadd.xlane.f32.xlu0 %v40_v6  ;;  %35 = vadd.xlane.f32.xlu1 %v34_v7 }
   0x8   :  { %376 = vmatpush3.bf16.msra.mxu1 %v380_v37  ;;  %360 = vmatpush3.bf16.msra.mxu0 %v380_v37 }
   0xb   :  { %44 = vadd.xlane.f32.xlu0 %v43_v9 }
  0x90   :  { %v39_v10 = vpop.xlane.xlu0 %38  ;;  %v33_v11 = vpop.xlane.xlu1 %32 }
  0x91   :  { %v49_v12 = vmul.f32 0.03125, %v39_v10  ;;  %v47_v13 = vmul.f32 0.03125, %v33_v11 }
  0x93   :  { %v456_v14 = vsub.f32 %v27_v0, %v49_v12  ;;  %v458_v15 = vsub.f32 %v25_v2, %v47_v13 }
  0x94   :  { %v42_v16 = vpop.xlane.xlu0 %41  ;;  %v36_v17 = vpop.xlane.xlu1 %35 }
  0x95   :  { %v50_v18 = vmul.f32 0.03125, %v42_v16  ;;  %v59_v19 = vmul.f32 %v456_v14, %v456_v14  ;;  %v48_v20 = vmul.f32 0.03125, %v36_v17  ;;  %v57_v21 = vmul.f32 %v458_v15, %v458_v15 }
  0x97   :  { %v464_v22 = vsub.f32 %v28_v1, %v50_v18  ;;  %v68_v23 = vsel %vm30_vm0, %v59_v19, 0.0  ;;  %v467_v24 = vsub.f32 %v26_v5, %v48_v20  ;;  %v62_v28 = vsel %vm30_vm0, %v57_v21, 0.0  ;;  %v317_v19 = vld [vmem:[%s532_s4] ss:$0 sm:$0xff] }
  0x98   :  { %v45_v25 = vpop.xlane.xlu0 %44  ;;  %69 = vadd.xlane.f32.xlu1 %v68_v23 }
  0x99   :  { %v51_v26 = vmul.f32 0.03125, %v45_v25  ;;  %v60_v27 = vmul.f32 %v464_v22, %v464_v22  ;;  %v58_v29 = vmul.f32 %v467_v24, %v467_v24 }
  0x9b   :  { %v474_v30 = vsub.f32 %v29_v8, %v51_v26  ;;  %v71_v31 = vsel %vm30_vm0, %v60_v27, 0.0  ;;  %v65_v33 = vsel %vm30_vm0, %v58_v29, 0.0 }
  0x9c   :  { %72 = vadd.xlane.f32.xlu0 %v71_v31  ;;  %63 = vadd.xlane.f32.xlu1 %v62_v28 }
  0x9d   :  { %v61_v32 = vmul.f32 %v474_v30, %v474_v30 }
  0x9f   :  { %v74_v34 = vsel %vm30_vm0, %v61_v32, 0.0 }
  0xa0   :  { %75 = vadd.xlane.f32.xlu1 %v74_v34  ;;  %66 = vadd.xlane.f32.xlu0 %v65_v33 }
 0x125   :  { %v70_v38 = vpop.xlane.xlu1 %69 }
 0x126   :  { %v79_v39 = vmul.f32 0.03125, %v70_v38 }
 0x128   :  { %v84_v40 = vadd.f32 1e-05, %v79_v39 }
 0x129   :  { %v73_v41 = vpop.xlane.xlu0 %72  ;;  %v64_v42 = vpop.xlane.xlu1 %63 }
 0x12a   :  { %384 = vrsqrt.f32 %v84_v40  ;;  %v80_v43 = vmul.f32 0.03125, %v73_v41  ;;  %v77_v44 = vmul.f32 0.03125, %v64_v42 }
 0x12c   :  { %v85_v45 = vadd.f32 1e-05, %v80_v43  ;;  %v82_v46 = vadd.f32 1e-05, %v77_v44 }
 0x12d   :  { %v67_v47 = vpop.xlane.xlu0 %66  ;;  %v76_v48 = vpop.xlane.xlu1 %75 }
 0x12e   :  { %386 = vrsqrt.f32 %v85_v45  ;;  %v78_v49 = vmul.f32 0.03125, %v67_v47  ;;  %v81_v50 = vmul.f32 0.03125, %v76_v48 }
 0x12f   :  { %388 = vrsqrt.f32 %v82_v46 }
 0x130   :  { %v83_v51 = vadd.f32 1e-05, %v78_v49  ;;  %v86_v52 = vadd.f32 1e-05, %v81_v50 }
 0x132   :  { %390 = vrsqrt.f32 %v83_v51 }
 0x133   :  { %392 = vrsqrt.f32 %v86_v52 }
 0x134   :  { %v385_v53 = vpop.eup %384 }
 0x135   :  { %v94_v55 = vmul.f32 %v385_v53, %v456_v14 }
 0x137   :  { %v106_v57 = vmul.f32 %v310_v54, %v94_v55 }
 0x138   :  { %v387_v58 = vpop.eup %386 }
 0x139   :  { %v389_v59 = vpop.eup %388  ;;  %v118_v60 = vadd.f32 %v311_v56, %v106_v57  ;;  %v95_v61 = vmul.f32 %v387_v58, %v464_v22 }
 0x13a   :  { %v92_v62 = vmul.f32 %v389_v59, %v458_v15 }
 0x13b   :  { %v333_v63 = vpack.c.bf16 %v118_v60, %v118_v60  ;;  %v107_v0 = vmul.f32 %v310_v54, %v95_v61 }
 0x13c   :  { %v391_v1 = vpop.eup %390  ;;  %v104_v2 = vmul.f32 %v310_v54, %v92_v62 }
 0x13d   :  { %v393_v3 = vpop.eup %392  ;;  %145 = vst.msk [vmem:[#allocation2 + $0x8] sm:$0xf] %vm142_vm2, %v333_v63  ;;  %v119_v4 = vadd.f32 %v311_v56, %v107_v0  ;;  %v93_v5 = vmul.f32 %v391_v1, %v467_v24 }
 0x13e   :  { %v116_v6 = vadd.f32 %v311_v56, %v104_v2  ;;  %v96_v7 = vmul.f32 %v393_v3, %v474_v30 }
 0x13f   :  { %v334_v8 = vpack.c.bf16 %v119_v4, %v119_v4  ;;  %v105_v9 = vmul.f32 %v310_v54, %v93_v5 }
 0x140   :  { %v331_v10 = vpack.c.bf16 %v116_v6, %v116_v6  ;;  %v108_v11 = vmul.f32 %v310_v54, %v96_v7 }
 0x141   :  { %146 = vst.msk [vmem:[#allocation2 + $0xc] sm:$0xf] %vm142_vm2, %v334_v8  ;;  %v117_v12 = vadd.f32 %v311_v56, %v105_v9 }
 0x142   :  { %143 = vst.msk [vmem:[#allocation2] sm:$0xf] %vm142_vm2, %v331_v10  ;;  %v120_v13 = vadd.f32 %v311_v56, %v108_v11 }
 0x143   :  { %v332_v14 = vpack.c.bf16 %v117_v12, %v117_v12 }
 0x144   :  { %v335_v15 = vpack.c.bf16 %v120_v13, %v120_v13 }
 0x145   :  { %144 = vst.msk [vmem:[#allocation2 + $0x4] sm:$0xf] %vm142_vm2, %v332_v14 }
 0x146   :  { %147 = vst.msk [vmem:[#allocation2 + $0x10] sm:$0xf] %vm142_vm2, %v335_v15 }
 0x148   :  { %v381_v16 = vld [vmem:[#allocation2 + $0x8] sm:$0xff]  }
 0x149   :  { %366 = vmatmul.mubr.msk.bf16.vlgmr.msra.gmra.mrb[0].mxu1 %vm30_vm0, %v381_v16 }
 0x14a   :  { %369 = vmatprep.mubr.msk.bf16.mxu1 %vm405_vm1, %v404_v36 }
 0x14c   :  { %v382_v17 = vld [vmem:[#allocation2] sm:$0xff]  }
 0x14d   :  { %362 = vmatmul.mubr.msk.bf16.vlgmr.msra.gmra.mrb[0].mxu0 %vm30_vm0, %v382_v17  ;;  %v383_v18 = vld [vmem:[#allocation2 + $0x10] ss:$0 sps:$4 sm:$0xff]  }
 0x151   :  { %370 = vmatmul.mubr.msk.bf16.gmra.mrb[4].mxu1 %vm30_vm0, %v383_v18 }
 0x21c   :  { %v241_v20 = vpop.f32.mrb[0].mxu1 }
 0x21d   :  { %v242_v21 = vadd.f32 %v317_v19, %v241_v20  ;;  %v367_v22 = vpop.f32.mrb[1].mxu1 }
 0x21e   :  { %v244_v23 = vpop.f32.mrb[2].mxu1 }
 0x21f   :  { %v262_v24 = vmul.f32 0.70710677, %v242_v21  ;;  %v245_v25 = vadd.f32 %v317_v19, %v244_v23  ;;  %v368_v26 = vpop.f32.mrb[3].mxu1  ;;  %v257_v45 = vmul.f32 0.5, %v242_v21 }
 0x220   :  { %v233_v27 = vpop.f32.mrb[0].mxu0 }
 0x221   :  { %394 = verf.f32 %v262_v24  ;;  %v263_v28 = vmul.f32 0.70710677, %v245_v25  ;;  %v234_v29 = vadd.f32 %v317_v19, %v233_v27  ;;  %v363_v30 = vpop.f32.mrb[1].mxu0  ;;  %v258_v46 = vmul.f32 0.5, %v245_v25 }
 0x222   :  { %v236_v31 = vpop.f32.mrb[2].mxu0 }
 0x223   :  { %396 = verf.f32 %v263_v28  ;;  %v260_v32 = vmul.f32 0.70710677, %v234_v29  ;;  %v237_v33 = vadd.f32 %v317_v19, %v236_v31  ;;  %v364_v34 = vpop.f32.mrb[3].mxu0  ;;  %v255_v54 = vmul.f32 0.5, %v234_v29 }
 0x224   :  { %v249_v35 = vpop.f32.mrb[4].mxu1 }
 0x225   :  { %398 = verf.f32 %v260_v32  ;;  %v261_v36 = vmul.f32 0.70710677, %v237_v33  ;;  %v250_v37 = vadd.f32 %v317_v19, %v249_v35  ;;  %v371_v38 = vpop.f32.mrb[5].mxu1  ;;  %v256_v55 = vmul.f32 0.5, %v237_v33 }
 0x226   :  { %v252_v39 = vpop.f32.mrb[6].mxu1 }
 0x227   :  { %400 = verf.f32 %v261_v36  ;;  %v264_v40 = vmul.f32 0.70710677, %v250_v37  ;;  %v372_v41 = vpop.f32.mrb[7].mxu1  ;;  %v259_v60 = vmul.f32 0.5, %v250_v37 }
 0x229   :  { %402 = verf.f32 %v264_v40 }
 0x22b   :  { %v395_v42 = vpop.eup %394 }
 0x22c   :  { %v272_v43 = vadd.f32 1.0, %v395_v42 }
 0x22d   :  { %v397_v44 = vpop.eup %396 }
 0x22e   :  { %v273_v47 = vadd.f32 1.0, %v397_v44  ;;  %v277_v49 = vmul.f32 %v272_v43, %v257_v45 }
 0x22f   :  { %v399_v48 = vpop.eup %398 }
 0x230   :  { %v278_v50 = vmul.f32 %v273_v47, %v258_v46  ;;  %v270_v51 = vadd.f32 1.0, %v399_v48 }
 0x231   :  { %v401_v52 = vpop.eup %400 }
 0x232   :  { %v349_v53 = vpack.c.bf16 %v278_v50, %v277_v49  ;;  %v271_v56 = vadd.f32 1.0, %v401_v52  ;;  %v275_v58 = vmul.f32 %v270_v51, %v255_v54 }
 0x233   :  { %v403_v57 = vpop.eup %402 }
 0x234   :  { %351 = vst [vmem:[%s533_s5 + $0x8] sm:$0xff] %v349_v53   ;;  %v276_v59 = vmul.f32 %v271_v56, %v256_v55  ;;  %v274_v61 = vadd.f32 1.0, %v403_v57 }
 0x236   :  { %v344_v62 = vpack.c.bf16 %v276_v59, %v275_v58  ;;  %v279_v63 = vmul.f32 %v274_v61, %v259_v60 }
 0x238   :  { %345 = vst [vmem:[%s533_s5] sm:$0xff] %v344_v62   ;;  %v340_v0 = vpack.c.bf16 %v279_v63, %v279_v63 }
 0x23a   :  { %305 = vst [vmem:[%s533_s5 + $0x10] sm:$0xf] %v340_v0 }

// kernel: vit_forward.23
= control target key start
LH: loop header
LB: loop body
LE: loop exit
PB: predicated region body
PF: predicated region fallthrough
CT: control target
= control target key end

     0   :  { %vm26_vm0 = vcmask 261120   ;;  %v156_v8 = vmov 0.0   ;;  %vm157_vm1 = vmmov 0   ;;  %vm58_vm2 = vcmask 257024   ;;  %s212_s0 = inlined_call_operand.vmem [shape: f32[8,32], index: 0, kind: input, shape index: {}]   ;;  %s213_s3 = inlined_call_operand.vmem [shape: bf16[32,128], index: 3, kind: input, shape index: {}]   ;;  %s214_s1 = inlined_call_operand.vmem [shape: f32[1,32], index: 1, kind: input, shape index: {}]   ;;  %s215_s2 = inlined_call_operand.vmem [shape: f32[1,32], index: 2, kind: input, shape index: {}]   ;;  %s216_s4 = inlined_call_operand.vmem [shape: f32[1,128], index: 4, kind: input, shape index: {}]   ;;  %s217_s5 = inlined_call_operand.vmem [shape: f32[8,128], index: 5, kind: output, shape index: {}]  }
   0x1   :  { %v25_v0 = vld [vmem:[%s212_s0] sm:$0xff]  ;;  %142 = vmatprep.subr.bf16.mxu0 %v156_v8  ;;  %v153_v9 = vld [vmem:[%s213_s3 + $0x8] sm:$0xff]   ;;  %146 = vmatprep.mubr.msk.bf16.mxu0 %vm157_vm1, %v156_v8 }
   0x2   :  { %v27_v1 = vsel %vm26_vm0, %v25_v0, 0.0  ;;  %v152_v7 = vld [vmem:[%s213_s3] sm:$0xff]  }
   0x3   :  { %28 = vadd.xlane.f32.xlu0 %v27_v1  ;;  %143 = vmatpush3.bf16.msra.mxu0 %v152_v7  ;;  %v133_v14 = vld [vmem:[%s214_s1] ss:$0 sm:$0xff] }
   0x4   :  { %144 = vmatprep.subr.bf16.mxu0 %v156_v8  ;;  %v134_v16 = vld [vmem:[%s215_s2] ss:$0 sm:$0xff] }
   0x5   :  { %v135_v21 = vld [vmem:[%s216_s4] ss:$0 sm:$0xff] }
   0x7   :  { %145 = vmatpush3.bf16.msra.mxu0 %v153_v9 }
  0x90   :  { %v29_v2 = vpop.xlane.xlu0 %28 }
  0x91   :  { %v31_v3 = vmul.f32 0.03125, %v29_v2 }
  0x93   :  { %v32_v4 = vsub.f32 %v25_v0, %v31_v3 }
  0x95   :  { %v33_v5 = vmul.f32 %v32_v4, %v32_v4 }
  0x97   :  { %v34_v6 = vsel %vm26_vm0, %v33_v5, 0.0 }
  0x98   :  { %35 = vadd.xlane.f32.xlu0 %v34_v6 }
 0x125   :  { %v36_v10 = vpop.xlane.xlu0 %35 }
 0x126   :  { %v37_v11 = vmul.f32 0.03125, %v36_v10 }
 0x128   :  { %v38_v12 = vadd.f32 1e-05, %v37_v11 }
 0x12a   :  { %154 = vrsqrt.f32 %v38_v12 }
 0x134   :  { %v155_v13 = vpop.eup %154 }
 0x135   :  { %v40_v15 = vmul.f32 %v155_v13, %v32_v4 }
 0x137   :  { %v48_v17 = vmul.f32 %v133_v14, %v40_v15 }
 0x139   :  { %v56_v18 = vadd.f32 %v134_v16, %v48_v17 }
 0x13b   :  { %v57_v19 = vpack.c.bf16 %v56_v18, %v56_v18 }
 0x13d   :  { %59 = vst.msk [vmem:[#allocation2] sm:$0xf] %vm58_vm2, %v57_v19 }
 0x144   :  { %v60_v20 = vld [vmem:[#allocation2] sm:$0xf] }
 0x145   :  { %147 = vmatmul.mubr.msk.bf16.vlgmr.msra.gmra.mrb[0].mxu0 %vm26_vm0, %v60_v20 }
 0x218   :  { %v122_v22 = vpop.f32.mrb[0].mxu0 }
 0x219   :  { %v123_v23 = vadd.f32 %v135_v21, %v122_v22  ;;  %v148_v24 = vpop.f32.mrb[1].mxu0 }
 0x21a   :  { %v125_v25 = vpop.f32.mrb[2].mxu0 }
 0x21b   :  { %128 = vst [vmem:[%s217_s5] sm:$0xff] %v123_v23  ;;  %v149_v26 = vpop.f32.mrb[3].mxu0 }

</bundles_post_ra>
